<compile_context>
chip_gen: v7x
topology: tpu7x:2x2x1
jax: 0.10.0
libtpu: 0.0.40
codegen_flags: <defaults>
</compile_context>

<pallas_src>
import jax
import jax.numpy as jnp
from jax.experimental import pallas as pl
from jax.experimental.pallas import tpu as pltpu

# ---- small synthetic CLIP text-encoder config ----
VOCAB = 64
CTX = 8            # sequence / context length
D_MODEL = 32
N_HEADS = 4
D_HEAD = D_MODEL // N_HEADS
D_FF = 4 * D_MODEL
N_LAYERS = 2
EMBED_DIM = 16     # text_projection output dim
EPS = 1e-5


def _layernorm(x, g, b):
    # f32 statistics (keep LN math in f32 even with bf16 matmul operands)
    mu = jnp.mean(x, axis=-1, keepdims=True)
    var = jnp.mean((x - mu) ** 2, axis=-1, keepdims=True)
    return (x - mu) * jax.lax.rsqrt(var + EPS) * g + b


# ------------------ fused Pallas kernel (one sequence per grid step) ------------------
def clip_text_kernel(x_ref, onehot_ref,
                     ln1g_ref, ln1b_ref,
                     wq_ref, wk_ref, wv_ref, bq_ref, bk_ref, bv_ref,
                     wo_ref, bo_ref,
                     ln2g_ref, ln2b_ref,
                     w1_ref, b1_ref, w2_ref, b2_ref,
                     lnfg_ref, lnfb_ref, proj_ref,
                     o_ref):
    S, D = x_ref.shape[1], x_ref.shape[2]
    xf = x_ref[0]                                                   # [S, D] f32

    # additive causal mask built ONCE: 0 = keep, -1e30 = drop
    qi = jax.lax.broadcasted_iota(jnp.int32, (S, S), 0)
    ki = jax.lax.broadcasted_iota(jnp.int32, (S, S), 1)
    causal_add = jnp.where(ki <= qi, 0.0, -1e30).astype(jnp.float32)[None, :, :]  # [1,S,S]
    scale = 1.0 / (D_HEAD ** 0.5)

    # Static layer loop: all (tiny) weights stay resident in VMEM across layers.
    # TODO(synk): at real CLIP size (D=512, ctx=77, 12 layers) move the layer loop onto a
    # grid axis with per-layer weight BlockSpecs (streamed / double-buffered), carry the
    # residual in VMEM scratch, and raise vmem_limit_bytes; whole-model residency does not
    # fit v7x's 64 MiB VMEM.
    for l in range(N_LAYERS):
        # ---- causal self-attention (pre-LN) ----
        h = _layernorm(xf, ln1g_ref[l], ln1b_ref[l])
        hb = h.astype(jnp.bfloat16)                                  # bf16 operands, f32 acc
        q = jnp.dot(hb, wq_ref[l], preferred_element_type=jnp.float32) + bq_ref[l]
        k = jnp.dot(hb, wk_ref[l], preferred_element_type=jnp.float32) + bk_ref[l]
        v = jnp.dot(hb, wv_ref[l], preferred_element_type=jnp.float32) + bv_ref[l]

        # fold heads into the einsum batch dim (no per-head loop, no lane-axis concat)
        qh = jnp.transpose((q * scale).reshape(S, N_HEADS, D_HEAD), (1, 0, 2))   # [H,S,Dh]
        kh = jnp.transpose(k.reshape(S, N_HEADS, D_HEAD), (1, 0, 2))             # [H,S,Dh]
        vh = jnp.transpose(v.reshape(S, N_HEADS, D_HEAD), (1, 0, 2))             # [H,S,Dh]

        s = jnp.einsum("hqd,hkd->hqk",
                       qh.astype(jnp.bfloat16), kh.astype(jnp.bfloat16),
                       preferred_element_type=jnp.float32) + causal_add          # [H,S,S] f32
        s = s - jnp.max(s, axis=-1, keepdims=True)
        p = jnp.exp(s)
        # softmax denominator on the EUP (otherwise-idle slot) instead of a VALU divide
        p = p * pl.reciprocal(jnp.sum(p, axis=-1, keepdims=True), approx=True)

        ctx = jnp.einsum("hqk,hkd->hqd",
                         p.astype(jnp.bfloat16), vh.astype(jnp.bfloat16),
                         preferred_element_type=jnp.float32)                     # [H,S,Dh]
        attn = jnp.transpose(ctx, (1, 0, 2)).reshape(S, D)                       # [S,D]
        attn = jnp.dot(attn.astype(jnp.bfloat16), wo_ref[l],
                       preferred_element_type=jnp.float32) + bo_ref[l]
        xf = xf + attn                                                           # residual f32

        # ---- MLP (pre-LN, QuickGELU as in OpenAI CLIP) ----
        h2 = _layernorm(xf, ln2g_ref[l], ln2b_ref[l])
        h2 = jnp.dot(h2.astype(jnp.bfloat16), w1_ref[l],
                     preferred_element_type=jnp.float32) + b1_ref[l]
        h2 = h2 * jax.nn.sigmoid(1.702 * h2)                                     # QuickGELU f32
        h2 = jnp.dot(h2.astype(jnp.bfloat16), w2_ref[l],
                     preferred_element_type=jnp.float32) + b2_ref[l]
        xf = xf + h2

    # ---- EOT token selection: exact one-hot matmul, no scalar gather ----
    x_eot = jnp.dot(onehot_ref[0], xf, preferred_element_type=jnp.float32)       # [1, D]

    # ---- ln_final + text_projection ----
    hf = _layernorm(x_eot, lnfg_ref[...], lnfb_ref[...])
    o_ref[0] = jnp.dot(hf.astype(jnp.bfloat16), proj_ref[...],
                       preferred_element_type=jnp.float32)                       # [1, E]


# ------------------ wrapper ------------------
def clip_encode_text(params, tokens):
    """Equivalent of ClipWrapper.forward(tokens) == clip_model.encode_text(tokens)."""
    B, S = tokens.shape
    assert S == CTX
    # glue in XLA: embedding gather + positional add (data-dependent gather stays outside)
    x = (jnp.take(params["tok_emb"], tokens, axis=0)
         + params["pos_emb"][None, :, :]).astype(jnp.float32)                    # [B,S,D]
    # CLIP takes features at the argmax-token-id position (EOT has the largest id with the
    # real tokenizer; arbitrary for synthetic random tokens)
    eot_idx = jnp.argmax(tokens, axis=-1)                                        # [B]
    onehot = jax.nn.one_hot(eot_idx, S, dtype=jnp.float32)[:, None, :]           # [B,1,S]

    D = D_MODEL
    wqkv, bqkv = params["w_qkv"], params["b_qkv"]
    # bf16 matmul operands (weights); biases / LN params stay f32
    warrs = [
        params["ln1_g"], params["ln1_b"],
        wqkv[:, :, 0 * D:1 * D].astype(jnp.bfloat16),
        wqkv[:, :, 1 * D:2 * D].astype(jnp.bfloat16),
        wqkv[:, :, 2 * D:3 * D].astype(jnp.bfloat16),
        bqkv[:, :, 0 * D:1 * D],
        bqkv[:, :, 1 * D:2 * D],
        bqkv[:, :, 2 * D:3 * D],
        params["w_o"].astype(jnp.bfloat16), params["b_o"],
        params["ln2_g"], params["ln2_b"],
        params["w_fc1"].astype(jnp.bfloat16), params["b_fc1"],
        params["w_fc2"].astype(jnp.bfloat16), params["b_fc2"],
        params["ln_f_g"], params["ln_f_b"],
        params["text_proj"].astype(jnp.bfloat16),
    ]

    def resident(w):  # whole weight resident in VMEM, same block every grid step
        nd = w.ndim
        return pl.BlockSpec(w.shape, lambda b, nd=nd: (0,) * nd)

    out3 = pl.pallas_call(
        clip_text_kernel,
        out_shape=jax.ShapeDtypeStruct((B, 1, EMBED_DIM), jnp.float32),
        grid_spec=pltpu.PrefetchScalarGridSpec(
            num_scalar_prefetch=0,
            grid=(B,),                                        # one sequence per grid step
            in_specs=[pl.BlockSpec((1, S, D_MODEL), lambda b: (b, 0, 0)),
                      pl.BlockSpec((1, 1, S), lambda b: (b, 0, 0))]
                     + [resident(w) for w in warrs],
            out_specs=pl.BlockSpec((1, 1, EMBED_DIM), lambda b: (b, 0, 0)),
        ),
        compiler_params=pltpu.CompilerParams(
            # independent per-sequence work: lets v7x shard grid steps across its 2 TCs
            dimension_semantics=("parallel",),
            # TODO(synk): at real CLIP sizes also set vmem_limit_bytes sized to
            # double-buffered per-layer weight slabs + activations (headroom under 64 MiB).
        ),
    )(x, onehot, *warrs)
    return out3[:, 0, :]                                       # [B, EMBED_DIM]


def init_params(key):
    def nrm(k, shape, scale=0.02):
        return scale * jax.random.normal(k, shape, dtype=jnp.float32)

    keys = jax.random.split(key, 3 + 4 * N_LAYERS)
    p = {
        "tok_emb": nrm(keys[0], (VOCAB, D_MODEL)),
        "pos_emb": nrm(keys[1], (CTX, D_MODEL), 0.01),
        "ln_f_g": jnp.ones((1, D_MODEL), jnp.float32),
        "ln_f_b": jnp.zeros((1, D_MODEL), jnp.float32),
        "text_proj": nrm(keys[2], (D_MODEL, EMBED_DIM), D_MODEL ** -0.5),
    }
    wq, wo, w1, w2 = [], [], [], []
    for i in range(N_LAYERS):
        bk = keys[3 + 4 * i: 3 + 4 * (i + 1)]
        wq.append(nrm(bk[0], (D_MODEL, 3 * D_MODEL)))
        wo.append(nrm(bk[1], (D_MODEL, D_MODEL)))
        w1.append(nrm(bk[2], (D_MODEL, D_FF)))
        w2.append(nrm(bk[3], (D_FF, D_MODEL)))
    L = N_LAYERS
    p.update({
        "ln1_g": jnp.ones((L, 1, D_MODEL), jnp.float32),
        "ln1_b": jnp.zeros((L, 1, D_MODEL), jnp.float32),
        "w_qkv": jnp.stack(wq),
        "b_qkv": jnp.zeros((L, 1, 3 * D_MODEL), jnp.float32),
        "w_o": jnp.stack(wo),
        "b_o": jnp.zeros((L, 1, D_MODEL), jnp.float32),
        "ln2_g": jnp.ones((L, 1, D_MODEL), jnp.float32),
        "ln2_b": jnp.zeros((L, 1, D_MODEL), jnp.float32),
        "w_fc1": jnp.stack(w1),
        "b_fc1": jnp.zeros((L, 1, D_FF), jnp.float32),
        "w_fc2": jnp.stack(w2),
        "b_fc2": jnp.zeros((L, 1, D_MODEL), jnp.float32),
    })
    return p


if __name__ == "__main__":
    key = jax.random.PRNGKey(0)
    pkey, tkey = jax.random.split(key)
    params = init_params(pkey)

    B = 2
    # synthetic token ids (int32), shape [B, CTX]; argmax position acts as EOT
    tokens = jax.random.randint(tkey, (B, CTX), 0, VOCAB, dtype=jnp.int32)

    out = jax.jit(clip_encode_text)(params, tokens)
    out = jax.block_until_ready(out)
    assert out.shape == (B, EMBED_DIM)
    assert jnp.all(jnp.isfinite(out))
    print("KERNEL_OK")
</pallas_src>

<mosaic_0001>
module attributes {stable_mosaic.version = 11 : i64} {
  func.func @clip_text_kernel(%arg0: i32, %arg1: memref<1x8x32xf32, #tpu.memory_space<vmem>>, %arg2: memref<1x1x8xf32, #tpu.memory_space<vmem>>, %arg3: memref<2x1x32xf32, #tpu.memory_space<vmem>>, %arg4: memref<2x1x32xf32, #tpu.memory_space<vmem>>, %arg5: memref<2x32x32xbf16, #tpu.memory_space<vmem>>, %arg6: memref<2x32x32xbf16, #tpu.memory_space<vmem>>, %arg7: memref<2x32x32xbf16, #tpu.memory_space<vmem>>, %arg8: memref<2x1x32xf32, #tpu.memory_space<vmem>>, %arg9: memref<2x1x32xf32, #tpu.memory_space<vmem>>, %arg10: memref<2x1x32xf32, #tpu.memory_space<vmem>>, %arg11: memref<2x32x32xbf16, #tpu.memory_space<vmem>>, %arg12: memref<2x1x32xf32, #tpu.memory_space<vmem>>, %arg13: memref<2x1x32xf32, #tpu.memory_space<vmem>>, %arg14: memref<2x1x32xf32, #tpu.memory_space<vmem>>, %arg15: memref<2x32x128xbf16, #tpu.memory_space<vmem>>, %arg16: memref<2x1x128xf32, #tpu.memory_space<vmem>>, %arg17: memref<2x128x32xbf16, #tpu.memory_space<vmem>>, %arg18: memref<2x1x32xf32, #tpu.memory_space<vmem>>, %arg19: memref<1x32xf32, #tpu.memory_space<vmem>>, %arg20: memref<1x32xf32, #tpu.memory_space<vmem>>, %arg21: memref<32x16xbf16, #tpu.memory_space<vmem>>, %arg22: memref<1x1x16xf32, #tpu.memory_space<vmem>>) attributes {dimension_semantics = [#tpu.dimension_semantics<parallel>], iteration_bounds = array<i64: 2>, scalar_prefetch = 0 : i64, scratch_operands = 0 : i64, tpu.core_type = #tpu.core_type<tc>, window_params = [{transform_indices = @transform_0, window_bounds = array<i64: 1, 8, 32>}, {transform_indices = @transform_1, window_bounds = array<i64: 1, 1, 8>}, {pipeline_mode = #tpu.pipeline_mode<synchronous>, transform_indices = @transform_2, window_bounds = array<i64: 2, 1, 32>}, {pipeline_mode = #tpu.pipeline_mode<synchronous>, transform_indices = @transform_3, window_bounds = array<i64: 2, 1, 32>}, {pipeline_mode = #tpu.pipeline_mode<synchronous>, transform_indices = @transform_4, window_bounds = array<i64: 2, 32, 32>}, {pipeline_mode = #tpu.pipeline_mode<synchronous>, transform_indices = @transform_5, window_bounds = array<i64: 2, 32, 32>}, {pipeline_mode = #tpu.pipeline_mode<synchronous>, transform_indices = @transform_6, window_bounds = array<i64: 2, 32, 32>}, {pipeline_mode = #tpu.pipeline_mode<synchronous>, transform_indices = @transform_7, window_bounds = array<i64: 2, 1, 32>}, {pipeline_mode = #tpu.pipeline_mode<synchronous>, transform_indices = @transform_8, window_bounds = array<i64: 2, 1, 32>}, {pipeline_mode = #tpu.pipeline_mode<synchronous>, transform_indices = @transform_9, window_bounds = array<i64: 2, 1, 32>}, {pipeline_mode = #tpu.pipeline_mode<synchronous>, transform_indices = @transform_10, window_bounds = array<i64: 2, 32, 32>}, {pipeline_mode = #tpu.pipeline_mode<synchronous>, transform_indices = @transform_11, window_bounds = array<i64: 2, 1, 32>}, {pipeline_mode = #tpu.pipeline_mode<synchronous>, transform_indices = @transform_12, window_bounds = array<i64: 2, 1, 32>}, {pipeline_mode = #tpu.pipeline_mode<synchronous>, transform_indices = @transform_13, window_bounds = array<i64: 2, 1, 32>}, {pipeline_mode = #tpu.pipeline_mode<synchronous>, transform_indices = @transform_14, window_bounds = array<i64: 2, 32, 128>}, {pipeline_mode = #tpu.pipeline_mode<synchronous>, transform_indices = @transform_15, window_bounds = array<i64: 2, 1, 128>}, {pipeline_mode = #tpu.pipeline_mode<synchronous>, transform_indices = @transform_16, window_bounds = array<i64: 2, 128, 32>}, {pipeline_mode = #tpu.pipeline_mode<synchronous>, transform_indices = @transform_17, window_bounds = array<i64: 2, 1, 32>}, {pipeline_mode = #tpu.pipeline_mode<synchronous>, transform_indices = @transform_18, window_bounds = array<i64: 1, 32>}, {pipeline_mode = #tpu.pipeline_mode<synchronous>, transform_indices = @transform_19, window_bounds = array<i64: 1, 32>}, {pipeline_mode = #tpu.pipeline_mode<synchronous>, transform_indices = @transform_20, window_bounds = array<i64: 32, 16>}, {transform_indices = @transform_21, window_bounds = array<i64: 1, 1, 16>}]} {
    %c0 = arith.constant 0 : index
    %c0_0 = arith.constant 0 : index
    %c0_1 = arith.constant 0 : index
    %0 = vector.load %arg1[%c0, %c0_0, %c0_1] : memref<1x8x32xf32, #tpu.memory_space<vmem>>, vector<1x8x32xf32>
    %1 = vector.shape_cast %0 : vector<1x8x32xf32> to vector<8x32xf32>
    %2 = tpu.iota {dimensions = array<i32: 0>} : vector<8x8xi32>
    %3 = tpu.iota {dimensions = array<i32: 1>} : vector<8x8xi32>
    %4 = arith.cmpi sle, %3, %2 : vector<8x8xi32>
    %cst = arith.constant 0.000000e+00 : f32
    %cst_2 = arith.constant -1.000000e+30 : f32
    %5 = vector.broadcast %cst : f32 to vector<8x8xf32>
    %6 = vector.broadcast %cst_2 : f32 to vector<8x8xf32>
    %7 = arith.select %4, %5, %6 : vector<8x8xi1>, vector<8x8xf32>
    %8 = vector.shape_cast %7 : vector<8x8xf32> to vector<1x8x8xf32>
    %c0_3 = arith.constant 0 : index
    %c0_4 = arith.constant 0 : index
    %c0_5 = arith.constant 0 : index
    %9 = vector.load %arg3[%c0_3, %c0_4, %c0_5] : memref<2x1x32xf32, #tpu.memory_space<vmem>>, vector<1x1x32xf32>
    %10 = vector.shape_cast %9 : vector<1x1x32xf32> to vector<1x32xf32>
    %c0_6 = arith.constant 0 : index
    %c0_7 = arith.constant 0 : index
    %c0_8 = arith.constant 0 : index
    %11 = vector.load %arg4[%c0_6, %c0_7, %c0_8] : memref<2x1x32xf32, #tpu.memory_space<vmem>>, vector<1x1x32xf32>
    %12 = vector.shape_cast %11 : vector<1x1x32xf32> to vector<1x32xf32>
    %cst_9 = arith.constant dense<0.000000e+00> : vector<8xf32>
    %13 = vector.multi_reduction <add>, %1, %cst_9 [1] : vector<8x32xf32> to vector<8xf32>
    %14 = vector.shape_cast %13 : vector<8xf32> to vector<8x1xf32>
    %cst_10 = arith.constant 3.200000e+01 : f32
    %15 = vector.broadcast %cst_10 : f32 to vector<8x1xf32>
    %16 = arith.divf %14, %15 : vector<8x1xf32>
    %17 = vector.broadcast %16 : vector<8x1xf32> to vector<8x32xf32>
    %18 = arith.subf %1, %17 : vector<8x32xf32>
    %19 = arith.mulf %18, %18 : vector<8x32xf32>
    %cst_11 = arith.constant dense<0.000000e+00> : vector<8xf32>
    %20 = vector.multi_reduction <add>, %19, %cst_11 [1] : vector<8x32xf32> to vector<8xf32>
    %21 = vector.shape_cast %20 : vector<8xf32> to vector<8x1xf32>
    %cst_12 = arith.constant 3.200000e+01 : f32
    %22 = vector.broadcast %cst_12 : f32 to vector<8x1xf32>
    %23 = arith.divf %21, %22 : vector<8x1xf32>
    %24 = vector.broadcast %16 : vector<8x1xf32> to vector<8x32xf32>
    %25 = arith.subf %1, %24 : vector<8x32xf32>
    %cst_13 = arith.constant 9.99999974E-6 : f32
    %26 = vector.broadcast %cst_13 : f32 to vector<8x1xf32>
    %27 = arith.addf %23, %26 : vector<8x1xf32>
    %28 = math.rsqrt %27 : vector<8x1xf32>
    %29 = vector.broadcast %28 : vector<8x1xf32> to vector<8x32xf32>
    %30 = arith.mulf %25, %29 : vector<8x32xf32>
    %31 = vector.broadcast %10 : vector<1x32xf32> to vector<8x32xf32>
    %32 = arith.mulf %30, %31 : vector<8x32xf32>
    %33 = vector.broadcast %12 : vector<1x32xf32> to vector<8x32xf32>
    %34 = arith.addf %32, %33 : vector<8x32xf32>
    %35 = arith.truncf %34 : vector<8x32xf32> to vector<8x32xbf16>
    %c0_14 = arith.constant 0 : index
    %c0_15 = arith.constant 0 : index
    %c0_16 = arith.constant 0 : index
    %36 = vector.load %arg5[%c0_14, %c0_15, %c0_16] : memref<2x32x32xbf16, #tpu.memory_space<vmem>>, vector<1x32x32xbf16>
    %37 = vector.shape_cast %36 : vector<1x32x32xbf16> to vector<32x32xbf16>
    %cst_17 = arith.constant dense<0.000000e+00> : vector<8x32xf32>
    %38 = tpu.matmul %35, %37, %cst_17 {dimension_numbers = #tpu.dot_dimension_numbers<[1], [0], [0], [1], [0, 0, 1, 1], [], []>} : vector<8x32xbf16>, vector<32x32xbf16>, vector<8x32xf32> -> vector<8x32xf32>
    %c0_18 = arith.constant 0 : index
    %c0_19 = arith.constant 0 : index
    %c0_20 = arith.constant 0 : index
    %39 = vector.load %arg8[%c0_18, %c0_19, %c0_20] : memref<2x1x32xf32, #tpu.memory_space<vmem>>, vector<1x1x32xf32>
    %40 = vector.shape_cast %39 : vector<1x1x32xf32> to vector<1x32xf32>
    %41 = vector.broadcast %40 : vector<1x32xf32> to vector<8x32xf32>
    %42 = arith.addf %38, %41 : vector<8x32xf32>
    %c0_21 = arith.constant 0 : index
    %c0_22 = arith.constant 0 : index
    %c0_23 = arith.constant 0 : index
    %43 = vector.load %arg6[%c0_21, %c0_22, %c0_23] : memref<2x32x32xbf16, #tpu.memory_space<vmem>>, vector<1x32x32xbf16>
    %44 = vector.shape_cast %43 : vector<1x32x32xbf16> to vector<32x32xbf16>
    %cst_24 = arith.constant dense<0.000000e+00> : vector<8x32xf32>
    %45 = tpu.matmul %35, %44, %cst_24 {dimension_numbers = #tpu.dot_dimension_numbers<[1], [0], [0], [1], [0, 0, 1, 1], [], []>} : vector<8x32xbf16>, vector<32x32xbf16>, vector<8x32xf32> -> vector<8x32xf32>
    %c0_25 = arith.constant 0 : index
    %c0_26 = arith.constant 0 : index
    %c0_27 = arith.constant 0 : index
    %46 = vector.load %arg9[%c0_25, %c0_26, %c0_27] : memref<2x1x32xf32, #tpu.memory_space<vmem>>, vector<1x1x32xf32>
    %47 = vector.shape_cast %46 : vector<1x1x32xf32> to vector<1x32xf32>
    %48 = vector.broadcast %47 : vector<1x32xf32> to vector<8x32xf32>
    %49 = arith.addf %45, %48 : vector<8x32xf32>
    %c0_28 = arith.constant 0 : index
    %c0_29 = arith.constant 0 : index
    %c0_30 = arith.constant 0 : index
    %50 = vector.load %arg7[%c0_28, %c0_29, %c0_30] : memref<2x32x32xbf16, #tpu.memory_space<vmem>>, vector<1x32x32xbf16>
    %51 = vector.shape_cast %50 : vector<1x32x32xbf16> to vector<32x32xbf16>
    %cst_31 = arith.constant dense<0.000000e+00> : vector<8x32xf32>
    %52 = tpu.matmul %35, %51, %cst_31 {dimension_numbers = #tpu.dot_dimension_numbers<[1], [0], [0], [1], [0, 0, 1, 1], [], []>} : vector<8x32xbf16>, vector<32x32xbf16>, vector<8x32xf32> -> vector<8x32xf32>
    %c0_32 = arith.constant 0 : index
    %c0_33 = arith.constant 0 : index
    %c0_34 = arith.constant 0 : index
    %53 = vector.load %arg10[%c0_32, %c0_33, %c0_34] : memref<2x1x32xf32, #tpu.memory_space<vmem>>, vector<1x1x32xf32>
    %54 = vector.shape_cast %53 : vector<1x1x32xf32> to vector<1x32xf32>
    %55 = vector.broadcast %54 : vector<1x32xf32> to vector<8x32xf32>
    %56 = arith.addf %52, %55 : vector<8x32xf32>
    %cst_35 = arith.constant 0.353553385 : f32
    %57 = vector.broadcast %cst_35 : f32 to vector<8x32xf32>
    %58 = arith.mulf %42, %57 : vector<8x32xf32>
    %59 = vector.shape_cast %58 : vector<8x32xf32> to vector<8x4x8xf32>
    %60 = tpu.transpose %59, [1, 0, 2] : vector<8x4x8xf32> -> vector<4x8x8xf32>
    %61 = vector.shape_cast %49 : vector<8x32xf32> to vector<8x4x8xf32>
    %62 = tpu.transpose %61, [1, 0, 2] : vector<8x4x8xf32> -> vector<4x8x8xf32>
    %63 = vector.shape_cast %56 : vector<8x32xf32> to vector<8x4x8xf32>
    %64 = tpu.transpose %63, [1, 0, 2] : vector<8x4x8xf32> -> vector<4x8x8xf32>
    %65 = arith.truncf %60 : vector<4x8x8xf32> to vector<4x8x8xbf16>
    %66 = arith.truncf %62 : vector<4x8x8xf32> to vector<4x8x8xbf16>
    "tpu.trace_start"() <{level = 10 : i32, message = "hqd,hkd->hqk"}> : () -> ()
    %cst_36 = arith.constant dense<0.000000e+00> : vector<4x8x8xf32>
    %67 = tpu.matmul %65, %66, %cst_36 {dimension_numbers = #tpu.dot_dimension_numbers<[2], [2], [1], [1], [0, 0, 0, 1, 1, 1], [0], [0]>} : vector<4x8x8xbf16>, vector<4x8x8xbf16>, vector<4x8x8xf32> -> vector<4x8x8xf32>
    "tpu.trace_stop"() : () -> ()
    %68 = vector.broadcast %8 : vector<1x8x8xf32> to vector<4x8x8xf32>
    %69 = arith.addf %67, %68 : vector<4x8x8xf32>
    %cst_37 = arith.constant dense<0xFF800000> : vector<4x8xf32>
    %70 = vector.multi_reduction <maximumf>, %69, %cst_37 [2] : vector<4x8x8xf32> to vector<4x8xf32>
    %71 = vector.shape_cast %70 : vector<4x8xf32> to vector<4x8x1xf32>
    %72 = vector.broadcast %71 : vector<4x8x1xf32> to vector<4x8x8xf32>
    %73 = arith.subf %69, %72 : vector<4x8x8xf32>
    %74 = math.exp %73 : vector<4x8x8xf32>
    %cst_38 = arith.constant dense<0.000000e+00> : vector<4x8xf32>
    %75 = vector.multi_reduction <add>, %74, %cst_38 [2] : vector<4x8x8xf32> to vector<4x8xf32>
    %76 = vector.shape_cast %75 : vector<4x8xf32> to vector<4x8x1xf32>
    %77 = tpu.reciprocal %76 {approx = true} : vector<4x8x1xf32> -> vector<4x8x1xf32>
    %78 = vector.broadcast %77 : vector<4x8x1xf32> to vector<4x8x8xf32>
    %79 = arith.mulf %74, %78 : vector<4x8x8xf32>
    %80 = arith.truncf %79 : vector<4x8x8xf32> to vector<4x8x8xbf16>
    %81 = arith.truncf %64 : vector<4x8x8xf32> to vector<4x8x8xbf16>
    "tpu.trace_start"() <{level = 10 : i32, message = "hqk,hkd->hqd"}> : () -> ()
    %cst_39 = arith.constant dense<0.000000e+00> : vector<4x8x8xf32>
    %82 = tpu.matmul %80, %81, %cst_39 {dimension_numbers = #tpu.dot_dimension_numbers<[2], [1], [1], [2], [0, 0, 0, 1, 1, 2], [0], [0]>} : vector<4x8x8xbf16>, vector<4x8x8xbf16>, vector<4x8x8xf32> -> vector<4x8x8xf32>
    "tpu.trace_stop"() : () -> ()
    %83 = tpu.transpose %82, [1, 0, 2] : vector<4x8x8xf32> -> vector<8x4x8xf32>
    %84 = vector.shape_cast %83 : vector<8x4x8xf32> to vector<8x32xf32>
    %85 = arith.truncf %84 : vector<8x32xf32> to vector<8x32xbf16>
    %c0_40 = arith.constant 0 : index
    %c0_41 = arith.constant 0 : index
    %c0_42 = arith.constant 0 : index
    %86 = vector.load %arg11[%c0_40, %c0_41, %c0_42] : memref<2x32x32xbf16, #tpu.memory_space<vmem>>, vector<1x32x32xbf16>
    %87 = vector.shape_cast %86 : vector<1x32x32xbf16> to vector<32x32xbf16>
    %cst_43 = arith.constant dense<0.000000e+00> : vector<8x32xf32>
    %88 = tpu.matmul %85, %87, %cst_43 {dimension_numbers = #tpu.dot_dimension_numbers<[1], [0], [0], [1], [0, 0, 1, 1], [], []>} : vector<8x32xbf16>, vector<32x32xbf16>, vector<8x32xf32> -> vector<8x32xf32>
    %c0_44 = arith.constant 0 : index
    %c0_45 = arith.constant 0 : index
    %c0_46 = arith.constant 0 : index
    %89 = vector.load %arg12[%c0_44, %c0_45, %c0_46] : memref<2x1x32xf32, #tpu.memory_space<vmem>>, vector<1x1x32xf32>
    %90 = vector.shape_cast %89 : vector<1x1x32xf32> to vector<1x32xf32>
    %91 = vector.broadcast %90 : vector<1x32xf32> to vector<8x32xf32>
    %92 = arith.addf %88, %91 : vector<8x32xf32>
    %93 = arith.addf %1, %92 : vector<8x32xf32>
    %c0_47 = arith.constant 0 : index
    %c0_48 = arith.constant 0 : index
    %c0_49 = arith.constant 0 : index
    %94 = vector.load %arg13[%c0_47, %c0_48, %c0_49] : memref<2x1x32xf32, #tpu.memory_space<vmem>>, vector<1x1x32xf32>
    %95 = vector.shape_cast %94 : vector<1x1x32xf32> to vector<1x32xf32>
    %c0_50 = arith.constant 0 : index
    %c0_51 = arith.constant 0 : index
    %c0_52 = arith.constant 0 : index
    %96 = vector.load %arg14[%c0_50, %c0_51, %c0_52] : memref<2x1x32xf32, #tpu.memory_space<vmem>>, vector<1x1x32xf32>
    %97 = vector.shape_cast %96 : vector<1x1x32xf32> to vector<1x32xf32>
    %cst_53 = arith.constant dense<0.000000e+00> : vector<8xf32>
    %98 = vector.multi_reduction <add>, %93, %cst_53 [1] : vector<8x32xf32> to vector<8xf32>
    %99 = vector.shape_cast %98 : vector<8xf32> to vector<8x1xf32>
    %cst_54 = arith.constant 3.200000e+01 : f32
    %100 = vector.broadcast %cst_54 : f32 to vector<8x1xf32>
    %101 = arith.divf %99, %100 : vector<8x1xf32>
    %102 = vector.broadcast %101 : vector<8x1xf32> to vector<8x32xf32>
    %103 = arith.subf %93, %102 : vector<8x32xf32>
    %104 = arith.mulf %103, %103 : vector<8x32xf32>
    %cst_55 = arith.constant dense<0.000000e+00> : vector<8xf32>
    %105 = vector.multi_reduction <add>, %104, %cst_55 [1] : vector<8x32xf32> to vector<8xf32>
    %106 = vector.shape_cast %105 : vector<8xf32> to vector<8x1xf32>
    %cst_56 = arith.constant 3.200000e+01 : f32
    %107 = vector.broadcast %cst_56 : f32 to vector<8x1xf32>
    %108 = arith.divf %106, %107 : vector<8x1xf32>
    %109 = vector.broadcast %101 : vector<8x1xf32> to vector<8x32xf32>
    %110 = arith.subf %93, %109 : vector<8x32xf32>
    %cst_57 = arith.constant 9.99999974E-6 : f32
    %111 = vector.broadcast %cst_57 : f32 to vector<8x1xf32>
    %112 = arith.addf %108, %111 : vector<8x1xf32>
    %113 = math.rsqrt %112 : vector<8x1xf32>
    %114 = vector.broadcast %113 : vector<8x1xf32> to vector<8x32xf32>
    %115 = arith.mulf %110, %114 : vector<8x32xf32>
    %116 = vector.broadcast %95 : vector<1x32xf32> to vector<8x32xf32>
    %117 = arith.mulf %115, %116 : vector<8x32xf32>
    %118 = vector.broadcast %97 : vector<1x32xf32> to vector<8x32xf32>
    %119 = arith.addf %117, %118 : vector<8x32xf32>
    %120 = arith.truncf %119 : vector<8x32xf32> to vector<8x32xbf16>
    %c0_58 = arith.constant 0 : index
    %c0_59 = arith.constant 0 : index
    %c0_60 = arith.constant 0 : index
    %121 = vector.load %arg15[%c0_58, %c0_59, %c0_60] : memref<2x32x128xbf16, #tpu.memory_space<vmem>>, vector<1x32x128xbf16>
    %122 = vector.shape_cast %121 : vector<1x32x128xbf16> to vector<32x128xbf16>
    %cst_61 = arith.constant dense<0.000000e+00> : vector<8x128xf32>
    %123 = tpu.matmul %120, %122, %cst_61 {dimension_numbers = #tpu.dot_dimension_numbers<[1], [0], [0], [1], [0, 0, 1, 1], [], []>} : vector<8x32xbf16>, vector<32x128xbf16>, vector<8x128xf32> -> vector<8x128xf32>
    %c0_62 = arith.constant 0 : index
    %c0_63 = arith.constant 0 : index
    %c0_64 = arith.constant 0 : index
    %124 = vector.load %arg16[%c0_62, %c0_63, %c0_64] : memref<2x1x128xf32, #tpu.memory_space<vmem>>, vector<1x1x128xf32>
    %125 = vector.shape_cast %124 : vector<1x1x128xf32> to vector<1x128xf32>
    %126 = vector.broadcast %125 : vector<1x128xf32> to vector<8x128xf32>
    %127 = arith.addf %123, %126 : vector<8x128xf32>
    %cst_65 = arith.constant 1.702000e+00 : f32
    %128 = vector.broadcast %cst_65 : f32 to vector<8x128xf32>
    %129 = arith.mulf %128, %127 : vector<8x128xf32>
    %130 = arith.negf %129 : vector<8x128xf32>
    %131 = math.exp %130 : vector<8x128xf32>
    %cst_66 = arith.constant 1.000000e+00 : f32
    %132 = vector.broadcast %cst_66 : f32 to vector<8x128xf32>
    %133 = arith.addf %132, %131 : vector<8x128xf32>
    %134 = arith.divf %132, %133 : vector<8x128xf32>
    %135 = arith.mulf %127, %134 : vector<8x128xf32>
    %136 = arith.truncf %135 : vector<8x128xf32> to vector<8x128xbf16>
    %c0_67 = arith.constant 0 : index
    %c0_68 = arith.constant 0 : index
    %c0_69 = arith.constant 0 : index
    %137 = vector.load %arg17[%c0_67, %c0_68, %c0_69] : memref<2x128x32xbf16, #tpu.memory_space<vmem>>, vector<1x128x32xbf16>
    %138 = vector.shape_cast %137 : vector<1x128x32xbf16> to vector<128x32xbf16>
    %cst_70 = arith.constant dense<0.000000e+00> : vector<8x32xf32>
    %139 = tpu.matmul %136, %138, %cst_70 {dimension_numbers = #tpu.dot_dimension_numbers<[1], [0], [0], [1], [0, 0, 1, 1], [], []>} : vector<8x128xbf16>, vector<128x32xbf16>, vector<8x32xf32> -> vector<8x32xf32>
    %c0_71 = arith.constant 0 : index
    %c0_72 = arith.constant 0 : index
    %c0_73 = arith.constant 0 : index
    %140 = vector.load %arg18[%c0_71, %c0_72, %c0_73] : memref<2x1x32xf32, #tpu.memory_space<vmem>>, vector<1x1x32xf32>
    %141 = vector.shape_cast %140 : vector<1x1x32xf32> to vector<1x32xf32>
    %142 = vector.broadcast %141 : vector<1x32xf32> to vector<8x32xf32>
    %143 = arith.addf %139, %142 : vector<8x32xf32>
    %144 = arith.addf %93, %143 : vector<8x32xf32>
    %c1 = arith.constant 1 : index
    %c0_74 = arith.constant 0 : index
    %c0_75 = arith.constant 0 : index
    %145 = vector.load %arg3[%c1, %c0_74, %c0_75] : memref<2x1x32xf32, #tpu.memory_space<vmem>>, vector<1x1x32xf32>
    %146 = vector.shape_cast %145 : vector<1x1x32xf32> to vector<1x32xf32>
    %c1_76 = arith.constant 1 : index
    %c0_77 = arith.constant 0 : index
    %c0_78 = arith.constant 0 : index
    %147 = vector.load %arg4[%c1_76, %c0_77, %c0_78] : memref<2x1x32xf32, #tpu.memory_space<vmem>>, vector<1x1x32xf32>
    %148 = vector.shape_cast %147 : vector<1x1x32xf32> to vector<1x32xf32>
    %cst_79 = arith.constant dense<0.000000e+00> : vector<8xf32>
    %149 = vector.multi_reduction <add>, %144, %cst_79 [1] : vector<8x32xf32> to vector<8xf32>
    %150 = vector.shape_cast %149 : vector<8xf32> to vector<8x1xf32>
    %cst_80 = arith.constant 3.200000e+01 : f32
    %151 = vector.broadcast %cst_80 : f32 to vector<8x1xf32>
    %152 = arith.divf %150, %151 : vector<8x1xf32>
    %153 = vector.broadcast %152 : vector<8x1xf32> to vector<8x32xf32>
    %154 = arith.subf %144, %153 : vector<8x32xf32>
    %155 = arith.mulf %154, %154 : vector<8x32xf32>
    %cst_81 = arith.constant dense<0.000000e+00> : vector<8xf32>
    %156 = vector.multi_reduction <add>, %155, %cst_81 [1] : vector<8x32xf32> to vector<8xf32>
    %157 = vector.shape_cast %156 : vector<8xf32> to vector<8x1xf32>
    %cst_82 = arith.constant 3.200000e+01 : f32
    %158 = vector.broadcast %cst_82 : f32 to vector<8x1xf32>
    %159 = arith.divf %157, %158 : vector<8x1xf32>
    %160 = vector.broadcast %152 : vector<8x1xf32> to vector<8x32xf32>
    %161 = arith.subf %144, %160 : vector<8x32xf32>
    %cst_83 = arith.constant 9.99999974E-6 : f32
    %162 = vector.broadcast %cst_83 : f32 to vector<8x1xf32>
    %163 = arith.addf %159, %162 : vector<8x1xf32>
    %164 = math.rsqrt %163 : vector<8x1xf32>
    %165 = vector.broadcast %164 : vector<8x1xf32> to vector<8x32xf32>
    %166 = arith.mulf %161, %165 : vector<8x32xf32>
    %167 = vector.broadcast %146 : vector<1x32xf32> to vector<8x32xf32>
    %168 = arith.mulf %166, %167 : vector<8x32xf32>
    %169 = vector.broadcast %148 : vector<1x32xf32> to vector<8x32xf32>
    %170 = arith.addf %168, %169 : vector<8x32xf32>
    %171 = arith.truncf %170 : vector<8x32xf32> to vector<8x32xbf16>
    %c1_84 = arith.constant 1 : index
    %c0_85 = arith.constant 0 : index
    %c0_86 = arith.constant 0 : index
    %172 = vector.load %arg5[%c1_84, %c0_85, %c0_86] : memref<2x32x32xbf16, #tpu.memory_space<vmem>>, vector<1x32x32xbf16>
    %173 = vector.shape_cast %172 : vector<1x32x32xbf16> to vector<32x32xbf16>
    %cst_87 = arith.constant dense<0.000000e+00> : vector<8x32xf32>
    %174 = tpu.matmul %171, %173, %cst_87 {dimension_numbers = #tpu.dot_dimension_numbers<[1], [0], [0], [1], [0, 0, 1, 1], [], []>} : vector<8x32xbf16>, vector<32x32xbf16>, vector<8x32xf32> -> vector<8x32xf32>
    %c1_88 = arith.constant 1 : index
    %c0_89 = arith.constant 0 : index
    %c0_90 = arith.constant 0 : index
    %175 = vector.load %arg8[%c1_88, %c0_89, %c0_90] : memref<2x1x32xf32, #tpu.memory_space<vmem>>, vector<1x1x32xf32>
    %176 = vector.shape_cast %175 : vector<1x1x32xf32> to vector<1x32xf32>
    %177 = vector.broadcast %176 : vector<1x32xf32> to vector<8x32xf32>
    %178 = arith.addf %174, %177 : vector<8x32xf32>
    %c1_91 = arith.constant 1 : index
    %c0_92 = arith.constant 0 : index
    %c0_93 = arith.constant 0 : index
    %179 = vector.load %arg6[%c1_91, %c0_92, %c0_93] : memref<2x32x32xbf16, #tpu.memory_space<vmem>>, vector<1x32x32xbf16>
    %180 = vector.shape_cast %179 : vector<1x32x32xbf16> to vector<32x32xbf16>
    %cst_94 = arith.constant dense<0.000000e+00> : vector<8x32xf32>
    %181 = tpu.matmul %171, %180, %cst_94 {dimension_numbers = #tpu.dot_dimension_numbers<[1], [0], [0], [1], [0, 0, 1, 1], [], []>} : vector<8x32xbf16>, vector<32x32xbf16>, vector<8x32xf32> -> vector<8x32xf32>
    %c1_95 = arith.constant 1 : index
    %c0_96 = arith.constant 0 : index
    %c0_97 = arith.constant 0 : index
    %182 = vector.load %arg9[%c1_95, %c0_96, %c0_97] : memref<2x1x32xf32, #tpu.memory_space<vmem>>, vector<1x1x32xf32>
    %183 = vector.shape_cast %182 : vector<1x1x32xf32> to vector<1x32xf32>
    %184 = vector.broadcast %183 : vector<1x32xf32> to vector<8x32xf32>
    %185 = arith.addf %181, %184 : vector<8x32xf32>
    %c1_98 = arith.constant 1 : index
    %c0_99 = arith.constant 0 : index
    %c0_100 = arith.constant 0 : index
    %186 = vector.load %arg7[%c1_98, %c0_99, %c0_100] : memref<2x32x32xbf16, #tpu.memory_space<vmem>>, vector<1x32x32xbf16>
    %187 = vector.shape_cast %186 : vector<1x32x32xbf16> to vector<32x32xbf16>
    %cst_101 = arith.constant dense<0.000000e+00> : vector<8x32xf32>
    %188 = tpu.matmul %171, %187, %cst_101 {dimension_numbers = #tpu.dot_dimension_numbers<[1], [0], [0], [1], [0, 0, 1, 1], [], []>} : vector<8x32xbf16>, vector<32x32xbf16>, vector<8x32xf32> -> vector<8x32xf32>
    %c1_102 = arith.constant 1 : index
    %c0_103 = arith.constant 0 : index
    %c0_104 = arith.constant 0 : index
    %189 = vector.load %arg10[%c1_102, %c0_103, %c0_104] : memref<2x1x32xf32, #tpu.memory_space<vmem>>, vector<1x1x32xf32>
    %190 = vector.shape_cast %189 : vector<1x1x32xf32> to vector<1x32xf32>
    %191 = vector.broadcast %190 : vector<1x32xf32> to vector<8x32xf32>
    %192 = arith.addf %188, %191 : vector<8x32xf32>
    %cst_105 = arith.constant 0.353553385 : f32
    %193 = vector.broadcast %cst_105 : f32 to vector<8x32xf32>
    %194 = arith.mulf %178, %193 : vector<8x32xf32>
    %195 = vector.shape_cast %194 : vector<8x32xf32> to vector<8x4x8xf32>
    %196 = tpu.transpose %195, [1, 0, 2] : vector<8x4x8xf32> -> vector<4x8x8xf32>
    %197 = vector.shape_cast %185 : vector<8x32xf32> to vector<8x4x8xf32>
    %198 = tpu.transpose %197, [1, 0, 2] : vector<8x4x8xf32> -> vector<4x8x8xf32>
    %199 = vector.shape_cast %192 : vector<8x32xf32> to vector<8x4x8xf32>
    %200 = tpu.transpose %199, [1, 0, 2] : vector<8x4x8xf32> -> vector<4x8x8xf32>
    %201 = arith.truncf %196 : vector<4x8x8xf32> to vector<4x8x8xbf16>
    %202 = arith.truncf %198 : vector<4x8x8xf32> to vector<4x8x8xbf16>
    "tpu.trace_start"() <{level = 10 : i32, message = "hqd,hkd->hqk"}> : () -> ()
    %cst_106 = arith.constant dense<0.000000e+00> : vector<4x8x8xf32>
    %203 = tpu.matmul %201, %202, %cst_106 {dimension_numbers = #tpu.dot_dimension_numbers<[2], [2], [1], [1], [0, 0, 0, 1, 1, 1], [0], [0]>} : vector<4x8x8xbf16>, vector<4x8x8xbf16>, vector<4x8x8xf32> -> vector<4x8x8xf32>
    "tpu.trace_stop"() : () -> ()
    %204 = vector.broadcast %8 : vector<1x8x8xf32> to vector<4x8x8xf32>
    %205 = arith.addf %203, %204 : vector<4x8x8xf32>
    %cst_107 = arith.constant dense<0xFF800000> : vector<4x8xf32>
    %206 = vector.multi_reduction <maximumf>, %205, %cst_107 [2] : vector<4x8x8xf32> to vector<4x8xf32>
    %207 = vector.shape_cast %206 : vector<4x8xf32> to vector<4x8x1xf32>
    %208 = vector.broadcast %207 : vector<4x8x1xf32> to vector<4x8x8xf32>
    %209 = arith.subf %205, %208 : vector<4x8x8xf32>
    %210 = math.exp %209 : vector<4x8x8xf32>
    %cst_108 = arith.constant dense<0.000000e+00> : vector<4x8xf32>
    %211 = vector.multi_reduction <add>, %210, %cst_108 [2] : vector<4x8x8xf32> to vector<4x8xf32>
    %212 = vector.shape_cast %211 : vector<4x8xf32> to vector<4x8x1xf32>
    %213 = tpu.reciprocal %212 {approx = true} : vector<4x8x1xf32> -> vector<4x8x1xf32>
    %214 = vector.broadcast %213 : vector<4x8x1xf32> to vector<4x8x8xf32>
    %215 = arith.mulf %210, %214 : vector<4x8x8xf32>
    %216 = arith.truncf %215 : vector<4x8x8xf32> to vector<4x8x8xbf16>
    %217 = arith.truncf %200 : vector<4x8x8xf32> to vector<4x8x8xbf16>
    "tpu.trace_start"() <{level = 10 : i32, message = "hqk,hkd->hqd"}> : () -> ()
    %cst_109 = arith.constant dense<0.000000e+00> : vector<4x8x8xf32>
    %218 = tpu.matmul %216, %217, %cst_109 {dimension_numbers = #tpu.dot_dimension_numbers<[2], [1], [1], [2], [0, 0, 0, 1, 1, 2], [0], [0]>} : vector<4x8x8xbf16>, vector<4x8x8xbf16>, vector<4x8x8xf32> -> vector<4x8x8xf32>
    "tpu.trace_stop"() : () -> ()
    %219 = tpu.transpose %218, [1, 0, 2] : vector<4x8x8xf32> -> vector<8x4x8xf32>
    %220 = vector.shape_cast %219 : vector<8x4x8xf32> to vector<8x32xf32>
    %221 = arith.truncf %220 : vector<8x32xf32> to vector<8x32xbf16>
    %c1_110 = arith.constant 1 : index
    %c0_111 = arith.constant 0 : index
    %c0_112 = arith.constant 0 : index
    %222 = vector.load %arg11[%c1_110, %c0_111, %c0_112] : memref<2x32x32xbf16, #tpu.memory_space<vmem>>, vector<1x32x32xbf16>
    %223 = vector.shape_cast %222 : vector<1x32x32xbf16> to vector<32x32xbf16>
    %cst_113 = arith.constant dense<0.000000e+00> : vector<8x32xf32>
    %224 = tpu.matmul %221, %223, %cst_113 {dimension_numbers = #tpu.dot_dimension_numbers<[1], [0], [0], [1], [0, 0, 1, 1], [], []>} : vector<8x32xbf16>, vector<32x32xbf16>, vector<8x32xf32> -> vector<8x32xf32>
    %c1_114 = arith.constant 1 : index
    %c0_115 = arith.constant 0 : index
    %c0_116 = arith.constant 0 : index
    %225 = vector.load %arg12[%c1_114, %c0_115, %c0_116] : memref<2x1x32xf32, #tpu.memory_space<vmem>>, vector<1x1x32xf32>
    %226 = vector.shape_cast %225 : vector<1x1x32xf32> to vector<1x32xf32>
    %227 = vector.broadcast %226 : vector<1x32xf32> to vector<8x32xf32>
    %228 = arith.addf %224, %227 : vector<8x32xf32>
    %229 = arith.addf %144, %228 : vector<8x32xf32>
    %c1_117 = arith.constant 1 : index
    %c0_118 = arith.constant 0 : index
    %c0_119 = arith.constant 0 : index
    %230 = vector.load %arg13[%c1_117, %c0_118, %c0_119] : memref<2x1x32xf32, #tpu.memory_space<vmem>>, vector<1x1x32xf32>
    %231 = vector.shape_cast %230 : vector<1x1x32xf32> to vector<1x32xf32>
    %c1_120 = arith.constant 1 : index
    %c0_121 = arith.constant 0 : index
    %c0_122 = arith.constant 0 : index
    %232 = vector.load %arg14[%c1_120, %c0_121, %c0_122] : memref<2x1x32xf32, #tpu.memory_space<vmem>>, vector<1x1x32xf32>
    %233 = vector.shape_cast %232 : vector<1x1x32xf32> to vector<1x32xf32>
    %cst_123 = arith.constant dense<0.000000e+00> : vector<8xf32>
    %234 = vector.multi_reduction <add>, %229, %cst_123 [1] : vector<8x32xf32> to vector<8xf32>
    %235 = vector.shape_cast %234 : vector<8xf32> to vector<8x1xf32>
    %cst_124 = arith.constant 3.200000e+01 : f32
    %236 = vector.broadcast %cst_124 : f32 to vector<8x1xf32>
    %237 = arith.divf %235, %236 : vector<8x1xf32>
    %238 = vector.broadcast %237 : vector<8x1xf32> to vector<8x32xf32>
    %239 = arith.subf %229, %238 : vector<8x32xf32>
    %240 = arith.mulf %239, %239 : vector<8x32xf32>
    %cst_125 = arith.constant dense<0.000000e+00> : vector<8xf32>
    %241 = vector.multi_reduction <add>, %240, %cst_125 [1] : vector<8x32xf32> to vector<8xf32>
    %242 = vector.shape_cast %241 : vector<8xf32> to vector<8x1xf32>
    %cst_126 = arith.constant 3.200000e+01 : f32
    %243 = vector.broadcast %cst_126 : f32 to vector<8x1xf32>
    %244 = arith.divf %242, %243 : vector<8x1xf32>
    %245 = vector.broadcast %237 : vector<8x1xf32> to vector<8x32xf32>
    %246 = arith.subf %229, %245 : vector<8x32xf32>
    %cst_127 = arith.constant 9.99999974E-6 : f32
    %247 = vector.broadcast %cst_127 : f32 to vector<8x1xf32>
    %248 = arith.addf %244, %247 : vector<8x1xf32>
    %249 = math.rsqrt %248 : vector<8x1xf32>
    %250 = vector.broadcast %249 : vector<8x1xf32> to vector<8x32xf32>
    %251 = arith.mulf %246, %250 : vector<8x32xf32>
    %252 = vector.broadcast %231 : vector<1x32xf32> to vector<8x32xf32>
    %253 = arith.mulf %251, %252 : vector<8x32xf32>
    %254 = vector.broadcast %233 : vector<1x32xf32> to vector<8x32xf32>
    %255 = arith.addf %253, %254 : vector<8x32xf32>
    %256 = arith.truncf %255 : vector<8x32xf32> to vector<8x32xbf16>
    %c1_128 = arith.constant 1 : index
    %c0_129 = arith.constant 0 : index
    %c0_130 = arith.constant 0 : index
    %257 = vector.load %arg15[%c1_128, %c0_129, %c0_130] : memref<2x32x128xbf16, #tpu.memory_space<vmem>>, vector<1x32x128xbf16>
    %258 = vector.shape_cast %257 : vector<1x32x128xbf16> to vector<32x128xbf16>
    %cst_131 = arith.constant dense<0.000000e+00> : vector<8x128xf32>
    %259 = tpu.matmul %256, %258, %cst_131 {dimension_numbers = #tpu.dot_dimension_numbers<[1], [0], [0], [1], [0, 0, 1, 1], [], []>} : vector<8x32xbf16>, vector<32x128xbf16>, vector<8x128xf32> -> vector<8x128xf32>
    %c1_132 = arith.constant 1 : index
    %c0_133 = arith.constant 0 : index
    %c0_134 = arith.constant 0 : index
    %260 = vector.load %arg16[%c1_132, %c0_133, %c0_134] : memref<2x1x128xf32, #tpu.memory_space<vmem>>, vector<1x1x128xf32>
    %261 = vector.shape_cast %260 : vector<1x1x128xf32> to vector<1x128xf32>
    %262 = vector.broadcast %261 : vector<1x128xf32> to vector<8x128xf32>
    %263 = arith.addf %259, %262 : vector<8x128xf32>
    %cst_135 = arith.constant 1.702000e+00 : f32
    %264 = vector.broadcast %cst_135 : f32 to vector<8x128xf32>
    %265 = arith.mulf %264, %263 : vector<8x128xf32>
    %266 = arith.negf %265 : vector<8x128xf32>
    %267 = math.exp %266 : vector<8x128xf32>
    %cst_136 = arith.constant 1.000000e+00 : f32
    %268 = vector.broadcast %cst_136 : f32 to vector<8x128xf32>
    %269 = arith.addf %268, %267 : vector<8x128xf32>
    %270 = arith.divf %268, %269 : vector<8x128xf32>
    %271 = arith.mulf %263, %270 : vector<8x128xf32>
    %272 = arith.truncf %271 : vector<8x128xf32> to vector<8x128xbf16>
    %c1_137 = arith.constant 1 : index
    %c0_138 = arith.constant 0 : index
    %c0_139 = arith.constant 0 : index
    %273 = vector.load %arg17[%c1_137, %c0_138, %c0_139] : memref<2x128x32xbf16, #tpu.memory_space<vmem>>, vector<1x128x32xbf16>
    %274 = vector.shape_cast %273 : vector<1x128x32xbf16> to vector<128x32xbf16>
    %cst_140 = arith.constant dense<0.000000e+00> : vector<8x32xf32>
    %275 = tpu.matmul %272, %274, %cst_140 {dimension_numbers = #tpu.dot_dimension_numbers<[1], [0], [0], [1], [0, 0, 1, 1], [], []>} : vector<8x128xbf16>, vector<128x32xbf16>, vector<8x32xf32> -> vector<8x32xf32>
    %c1_141 = arith.constant 1 : index
    %c0_142 = arith.constant 0 : index
    %c0_143 = arith.constant 0 : index
    %276 = vector.load %arg18[%c1_141, %c0_142, %c0_143] : memref<2x1x32xf32, #tpu.memory_space<vmem>>, vector<1x1x32xf32>
    %277 = vector.shape_cast %276 : vector<1x1x32xf32> to vector<1x32xf32>
    %278 = vector.broadcast %277 : vector<1x32xf32> to vector<8x32xf32>
    %279 = arith.addf %275, %278 : vector<8x32xf32>
    %280 = arith.addf %229, %279 : vector<8x32xf32>
    %c0_144 = arith.constant 0 : index
    %c0_145 = arith.constant 0 : index
    %c0_146 = arith.constant 0 : index
    %281 = vector.load %arg2[%c0_144, %c0_145, %c0_146] : memref<1x1x8xf32, #tpu.memory_space<vmem>>, vector<1x1x8xf32>
    %282 = vector.shape_cast %281 : vector<1x1x8xf32> to vector<1x8xf32>
    %cst_147 = arith.constant dense<0.000000e+00> : vector<1x32xf32>
    %283 = tpu.matmul %282, %280, %cst_147 {dimension_numbers = #tpu.dot_dimension_numbers<[1], [0], [0], [1], [0, 0, 1, 1], [], []>} : vector<1x8xf32>, vector<8x32xf32>, vector<1x32xf32> -> vector<1x32xf32>
    %c0_148 = arith.constant 0 : index
    %c0_149 = arith.constant 0 : index
    %284 = vector.load %arg19[%c0_148, %c0_149] : memref<1x32xf32, #tpu.memory_space<vmem>>, vector<1x32xf32>
    %c0_150 = arith.constant 0 : index
    %c0_151 = arith.constant 0 : index
    %285 = vector.load %arg20[%c0_150, %c0_151] : memref<1x32xf32, #tpu.memory_space<vmem>>, vector<1x32xf32>
    %cst_152 = arith.constant dense<0.000000e+00> : vector<1xf32>
    %286 = vector.multi_reduction <add>, %283, %cst_152 [1] : vector<1x32xf32> to vector<1xf32>
    %287 = vector.shape_cast %286 : vector<1xf32> to vector<1x1xf32>
    %cst_153 = arith.constant 3.200000e+01 : f32
    %288 = vector.broadcast %cst_153 : f32 to vector<1x1xf32>
    %289 = arith.divf %287, %288 : vector<1x1xf32>
    %290 = vector.broadcast %289 : vector<1x1xf32> to vector<1x32xf32>
    %291 = arith.subf %283, %290 : vector<1x32xf32>
    %292 = arith.mulf %291, %291 : vector<1x32xf32>
    %cst_154 = arith.constant dense<0.000000e+00> : vector<1xf32>
    %293 = vector.multi_reduction <add>, %292, %cst_154 [1] : vector<1x32xf32> to vector<1xf32>
    %294 = vector.shape_cast %293 : vector<1xf32> to vector<1x1xf32>
    %cst_155 = arith.constant 3.200000e+01 : f32
    %295 = vector.broadcast %cst_155 : f32 to vector<1x1xf32>
    %296 = arith.divf %294, %295 : vector<1x1xf32>
    %297 = vector.broadcast %289 : vector<1x1xf32> to vector<1x32xf32>
    %298 = arith.subf %283, %297 : vector<1x32xf32>
    %cst_156 = arith.constant 9.99999974E-6 : f32
    %299 = vector.broadcast %cst_156 : f32 to vector<1x1xf32>
    %300 = arith.addf %296, %299 : vector<1x1xf32>
    %301 = math.rsqrt %300 : vector<1x1xf32>
    %302 = vector.broadcast %301 : vector<1x1xf32> to vector<1x32xf32>
    %303 = arith.mulf %298, %302 : vector<1x32xf32>
    %304 = arith.mulf %303, %284 : vector<1x32xf32>
    %305 = arith.addf %304, %285 : vector<1x32xf32>
    %306 = arith.truncf %305 : vector<1x32xf32> to vector<1x32xbf16>
    %c0_157 = arith.constant 0 : index
    %c0_158 = arith.constant 0 : index
    %307 = vector.load %arg21[%c0_157, %c0_158] : memref<32x16xbf16, #tpu.memory_space<vmem>>, vector<32x16xbf16>
    %cst_159 = arith.constant dense<0.000000e+00> : vector<1x16xf32>
    %308 = tpu.matmul %306, %307, %cst_159 {dimension_numbers = #tpu.dot_dimension_numbers<[1], [0], [0], [1], [0, 0, 1, 1], [], []>} : vector<1x32xbf16>, vector<32x16xbf16>, vector<1x16xf32> -> vector<1x16xf32>
    %c0_160 = arith.constant 0 : index
    %c0_161 = arith.constant 0 : index
    %c0_162 = arith.constant 0 : index
    %309 = vector.load %arg22[%c0_160, %c0_161, %c0_162] : memref<1x1x16xf32, #tpu.memory_space<vmem>>, vector<1x1x16xf32>
    %310 = vector.shape_cast %309 : vector<1x1x16xf32> to vector<1x16xf32>
    %311 = vector.shape_cast %308 : vector<1x16xf32> to vector<1x1x16xf32>
    tpu.vector_store %arg22[%c0_160, %c0_161, %c0_162], %311 {strides = array<i32>} : memref<1x1x16xf32, #tpu.memory_space<vmem>>, vector<1x1x16xf32>,
    return
  }
  func.func @transform_0(%arg0: i32) -> (i32, i32, i32) {
    %c0_i32 = arith.constant 0 : i32
    %c0_i32_0 = arith.constant 0 : i32
    %c0_i32_1 = arith.constant 0 : i32
    return %arg0, %c0_i32, %c0_i32_0 : i32, i32, i32
  }
  func.func @transform_1(%arg0: i32) -> (i32, i32, i32) {
    %c0_i32 = arith.constant 0 : i32
    %c0_i32_0 = arith.constant 0 : i32
    %c0_i32_1 = arith.constant 0 : i32
    return %arg0, %c0_i32, %c0_i32_0 : i32, i32, i32
  }
  func.func @transform_2(%arg0: i32) -> (i32, i32, i32) {
    %c0_i32 = arith.constant 0 : i32
    %c0_i32_0 = arith.constant 0 : i32
    %c0_i32_1 = arith.constant 0 : i32
    %c0_i32_2 = arith.constant 0 : i32
    return %c0_i32, %c0_i32_0, %c0_i32_1 : i32, i32, i32
  }
  func.func @transform_3(%arg0: i32) -> (i32, i32, i32) {
    %c0_i32 = arith.constant 0 : i32
    %c0_i32_0 = arith.constant 0 : i32
    %c0_i32_1 = arith.constant 0 : i32
    %c0_i32_2 = arith.constant 0 : i32
    return %c0_i32, %c0_i32_0, %c0_i32_1 : i32, i32, i32
  }
  func.func @transform_4(%arg0: i32) -> (i32, i32, i32) {
    %c0_i32 = arith.constant 0 : i32
    %c0_i32_0 = arith.constant 0 : i32
    %c0_i32_1 = arith.constant 0 : i32
    %c0_i32_2 = arith.constant 0 : i32
    return %c0_i32, %c0_i32_0, %c0_i32_1 : i32, i32, i32
  }
  func.func @transform_5(%arg0: i32) -> (i32, i32, i32) {
    %c0_i32 = arith.constant 0 : i32
    %c0_i32_0 = arith.constant 0 : i32
    %c0_i32_1 = arith.constant 0 : i32
    %c0_i32_2 = arith.constant 0 : i32
    return %c0_i32, %c0_i32_0, %c0_i32_1 : i32, i32, i32
  }
  func.func @transform_6(%arg0: i32) -> (i32, i32, i32) {
    %c0_i32 = arith.constant 0 : i32
    %c0_i32_0 = arith.constant 0 : i32
    %c0_i32_1 = arith.constant 0 : i32
    %c0_i32_2 = arith.constant 0 : i32
    return %c0_i32, %c0_i32_0, %c0_i32_1 : i32, i32, i32
  }
  func.func @transform_7(%arg0: i32) -> (i32, i32, i32) {
    %c0_i32 = arith.constant 0 : i32
    %c0_i32_0 = arith.constant 0 : i32
    %c0_i32_1 = arith.constant 0 : i32
    %c0_i32_2 = arith.constant 0 : i32
    return %c0_i32, %c0_i32_0, %c0_i32_1 : i32, i32, i32
  }
  func.func @transform_8(%arg0: i32) -> (i32, i32, i32) {
    %c0_i32 = arith.constant 0 : i32
    %c0_i32_0 = arith.constant 0 : i32
    %c0_i32_1 = arith.constant 0 : i32
    %c0_i32_2 = arith.constant 0 : i32
    return %c0_i32, %c0_i32_0, %c0_i32_1 : i32, i32, i32
  }
  func.func @transform_9(%arg0: i32) -> (i32, i32, i32) {
    %c0_i32 = arith.constant 0 : i32
    %c0_i32_0 = arith.constant 0 : i32
    %c0_i32_1 = arith.constant 0 : i32
    %c0_i32_2 = arith.constant 0 : i32
    return %c0_i32, %c0_i32_0, %c0_i32_1 : i32, i32, i32
  }
  func.func @transform_10(%arg0: i32) -> (i32, i32, i32) {
    %c0_i32 = arith.constant 0 : i32
    %c0_i32_0 = arith.constant 0 : i32
    %c0_i32_1 = arith.constant 0 : i32
    %c0_i32_2 = arith.constant 0 : i32
    return %c0_i32, %c0_i32_0, %c0_i32_1 : i32, i32, i32
  }
  func.func @transform_11(%arg0: i32) -> (i32, i32, i32) {
    %c0_i32 = arith.constant 0 : i32
    %c0_i32_0 = arith.constant 0 : i32
    %c0_i32_1 = arith.constant 0 : i32
    %c0_i32_2 = arith.constant 0 : i32
    return %c0_i32, %c0_i32_0, %c0_i32_1 : i32, i32, i32
  }
  func.func @transform_12(%arg0: i32) -> (i32, i32, i32) {
    %c0_i32 = arith.constant 0 : i32
    %c0_i32_0 = arith.constant 0 : i32
    %c0_i32_1 = arith.constant 0 : i32
    %c0_i32_2 = arith.constant 0 : i32
    return %c0_i32, %c0_i32_0, %c0_i32_1 : i32, i32, i32
  }
  func.func @transform_13(%arg0: i32) -> (i32, i32, i32) {
    %c0_i32 = arith.constant 0 : i32
    %c0_i32_0 = arith.constant 0 : i32
    %c0_i32_1 = arith.constant 0 : i32
    %c0_i32_2 = arith.constant 0 : i32
    return %c0_i32, %c0_i32_0, %c0_i32_1 : i32, i32, i32
  }
  func.func @transform_14(%arg0: i32) -> (i32, i32, i32) {
    %c0_i32 = arith.constant 0 : i32
    %c0_i32_0 = arith.constant 0 : i32
    %c0_i32_1 = arith.constant 0 : i32
    %c0_i32_2 = arith.constant 0 : i32
    return %c0_i32, %c0_i32_0, %c0_i32_1 : i32, i32, i32
  }
  func.func @transform_15(%arg0: i32) -> (i32, i32, i32) {
    %c0_i32 = arith.constant 0 : i32
    %c0_i32_0 = arith.constant 0 : i32
    %c0_i32_1 = arith.constant 0 : i32
    %c0_i32_2 = arith.constant 0 : i32
    return %c0_i32, %c0_i32_0, %c0_i32_1 : i32, i32, i32
  }
  func.func @transform_16(%arg0: i32) -> (i32, i32, i32) {
    %c0_i32 = arith.constant 0 : i32
    %c0_i32_0 = arith.constant 0 : i32
    %c0_i32_1 = arith.constant 0 : i32
    %c0_i32_2 = arith.constant 0 : i32
    return %c0_i32, %c0_i32_0, %c0_i32_1 : i32, i32, i32
  }
  func.func @transform_17(%arg0: i32) -> (i32, i32, i32) {
    %c0_i32 = arith.constant 0 : i32
    %c0_i32_0 = arith.constant 0 : i32
    %c0_i32_1 = arith.constant 0 : i32
    %c0_i32_2 = arith.constant 0 : i32
    return %c0_i32, %c0_i32_0, %c0_i32_1 : i32, i32, i32
  }
  func.func @transform_18(%arg0: i32) -> (i32, i32) {
    %c0_i32 = arith.constant 0 : i32
    %c0_i32_0 = arith.constant 0 : i32
    %c0_i32_1 = arith.constant 0 : i32
    return %c0_i32, %c0_i32_0 : i32, i32
  }
  func.func @transform_19(%arg0: i32) -> (i32, i32) {
    %c0_i32 = arith.constant 0 : i32
    %c0_i32_0 = arith.constant 0 : i32
    %c0_i32_1 = arith.constant 0 : i32
    return %c0_i32, %c0_i32_0 : i32, i32
  }
  func.func @transform_20(%arg0: i32) -> (i32, i32) {
    %c0_i32 = arith.constant 0 : i32
    %c0_i32_0 = arith.constant 0 : i32
    %c0_i32_1 = arith.constant 0 : i32
    return %c0_i32, %c0_i32_0 : i32, i32
  }
  func.func @transform_21(%arg0: i32) -> (i32, i32, i32) {
    %c0_i32 = arith.constant 0 : i32
    %c0_i32_0 = arith.constant 0 : i32
    %c0_i32_1 = arith.constant 0 : i32
    return %arg0, %c0_i32, %c0_i32_0 : i32, i32, i32
  }
}

</mosaic_0001>

<bundles_post_ra>
// kernel: clip_encode_text.1
= control target key start
LH: loop header
LB: loop body
LE: loop exit
PB: predicated region body
PF: predicated region fallthrough
CT: control target
= control target key end

     0   :  { %s5483_s0 = inlined_call_operand.vmem [shape: f32[2,8,32], index: 0, kind: input, shape index: {}]   ;;  %s5484_s1 = inlined_call_operand.vmem [shape: f32[2,1,8], index: 1, kind: input, shape index: {}]   ;;  %s5485_s2 = inlined_call_operand.vmem [shape: f32[2,1,32], index: 2, kind: input, shape index: {}]   ;;  %s5486_s3 = inlined_call_operand.vmem [shape: f32[2,1,32], index: 3, kind: input, shape index: {}]   ;;  %s5487_s4 = inlined_call_operand.vmem [shape: bf16[2,32,32], index: 4, kind: input, shape index: {}]   ;;  %s5488_s5 = inlined_call_operand.vmem [shape: bf16[2,32,32], index: 5, kind: input, shape index: {}]   ;;  %s5489_s6 = inlined_call_operand.vmem [shape: bf16[2,32,32], index: 6, kind: input, shape index: {}]   ;;  %s5490_s7 = inlined_call_operand.vmem [shape: f32[2,1,32], index: 7, kind: input, shape index: {}]   ;;  %s5491_s8 = inlined_call_operand.vmem [shape: f32[2,1,32], index: 8, kind: input, shape index: {}]   ;;  %s5492_s9 = inlined_call_operand.vmem [shape: f32[2,1,32], index: 9, kind: input, shape index: {}]   ;;  %s5493_s10 = inlined_call_operand.vmem [shape: bf16[2,32,32], index: 10, kind: input, shape index: {}]   ;;  %s5494_s11 = inlined_call_operand.vmem [shape: f32[2,1,32], index: 11, kind: input, shape index: {}]   ;;  %s5495_s12 = inlined_call_operand.vmem [shape: f32[2,1,32], index: 12, kind: input, shape index: {}]   ;;  %s5496_s13 = inlined_call_operand.vmem [shape: f32[2,1,32], index: 13, kind: input, shape index: {}]   ;;  %s5497_s14 = inlined_call_operand.vmem [shape: bf16[2,32,128], index: 14, kind: input, shape index: {}]   ;;  %s5498_s15 = inlined_call_operand.vmem [shape: f32[2,1,128], index: 15, kind: input, shape index: {}]   ;;  %s5499_s16 = inlined_call_operand.vmem [shape: bf16[2,128,32], index: 16, kind: input, shape index: {}]   ;;  %s5500_s17 = inlined_call_operand.vmem [shape: f32[2,1,32], index: 17, kind: input, shape index: {}]   ;;  %s5501_s18 = inlined_call_operand.vmem [shape: f32[1,32], index: 18, kind: input, shape index: {}]   ;;  %s5502_s19 = inlined_call_operand.vmem [shape: f32[1,32], index: 19, kind: input, shape index: {}]   ;;  %s5503_s20 = inlined_call_operand.vmem [shape: bf16[32,16], index: 20, kind: input, shape index: {}]   ;;  %s5504_s21 = inlined_call_operand.hbm [shape: f32[2,1,16], index: 21, kind: output, shape index: {}]  }
   0x1   :  { %5525 = sst [smem:[#allocation11_spill]] %s5483_s0 }
   0x2   :  { %5526 = sst [smem:[#allocation12_spill]] %s5484_s1 }
   0x3   :  { %5527 = sst [smem:[#allocation13_spill]] %s5485_s2 }
   0x4   :  { %5528 = sst [smem:[#allocation14_spill]] %s5486_s3 }
   0x5   :  { %5529 = sst [smem:[#allocation15_spill]] %s5487_s4 }
   0x6   :  { %5530 = sst [smem:[#allocation16_spill]] %s5488_s5 }
   0x7   :  { %5531 = sst [smem:[#allocation17_spill]] %s5489_s6 }
   0x8   :  { %5532 = sst [smem:[#allocation18_spill]] %s5490_s7 }
   0x9   :  { %5533 = sst [smem:[#allocation19_spill]] %s5504_s21 }
   0xa   :  { %26 = vsyncpa [#allocation3], 0 }
   0xb   :  { %28 = vsyncpa [#allocation3 + $0x1], 0  ;;  %s4772_s2 = smov 0   ;;  %s4774_s25 = smov 0  }
   0xc   :  { %s4776_s26 = smov 0   ;;  %s4778_s27 = smov 0  }
   0xd LB: > { %5534 = sst [smem:[#allocation5_spill]] %s4636_s2  ;;  %s4793_s3 = sadd.s32 4294967295, %s4648_s27   ;;  %s4648_s27 = sphi %s4778_s27, %s5561_s27   ;;  %s4644_s26 = sphi %s4776_s26, %s5563_s26   ;;  %s4640_s25 = sphi %s4774_s25, %s5565_s25   ;;  %s4636_s2 = sphi %s4772_s2, %s5564_s2  }
   0xe   : > { %5535 = sst [smem:[#allocation6_spill]] %s4644_s26  ;;  %s3976_s28 = sadd.s32 4294967294, %s4648_s27  }
   0xf   : > { %5536 = sst [smem:[#allocation7_spill]] %s4648_s27  ;;  %s4797_s29 = sadd.s32 1, %s4648_s27  }
  0x10   : > { %5537 = sst [smem:[#allocation8_spill]] %s4797_s29  ;;  %s492_s0 = sadd.s32 1, %s4644_s26 }
  0x11   : > { %s489_s4 = ssub.s32 %s4648_s27, %s4797_s29  ;;  %p502_p0 = scmp.ne.s32.totalorder %s4644_s26, %s4640_s25 }
  0x12   : > { %p490_p1 = scmp.eq.s32.totalorder %s489_s4, 0  ;;  %p503_p2 = scmp.eq.s32.totalorder %s4793_s3, 1 }
  0x13   : > { %p508_p3 = scmp.ne.s32.totalorder %s4640_s25, %s4636_s2  ;;  %p509_p4 = scmp.eq.s32.totalorder %s3976_s28, 1 }
  0x14   : > { %s4808_s30 = scalar_select %p490_p1, %s4644_s26, %s492_s0  }
  0x15   : > { %p4810_p5 = por %p503_p2, %p502_p0  ;;  %p4814_p6 = por %p509_p4, %p508_p3 }
  0x16   : > { %5538 = sst [smem:[#allocation9_spill]] %s4808_s30  ;;  %p3979_p7 = scmp.ge.s32.totalorder %s4648_s27, 1 }
  0x17   : > { %s5540_s22 = scalar_select %p4814_p6, 1, 0 }
  0x18   : > { %p597_p8 = scmp.lt.s32.totalorder %s4648_s27, 3 }
  0x19   : > { %5541 = sst [smem:[#allocation10_spill]] %s5540_s22 }
  0x1a   : > { %p598_p9 = pnand %p3979_p7, %p597_p8 }
  0x1b   : > { %p658_p10 = scmp.lt.s32.totalorder (!%p598_p9), %s4793_s3, 1  ;;  %vm675_vm0 = vcmask (!%p598_p9), 261120   ;;  %s5542_s0 = sld [smem:[#allocation11_spill]] (!%p598_p9)  ;;  %v4650_v9 = vmov (!%p598_p9), 0.0   ;;  %vm4651_vm1 = vmmov (!%p598_p9), 0   ;;  %v667_v41 = vlaneseq (!%p598_p9) }
  0x1c   : > { %601 = sbr.rel (%p598_p9) target bundleno = 6025 (0x1789), region = 104  ;;  %s5543_s29 = sld [smem:[#allocation15_spill]] (!%p598_p9)  ;;  %4219 = vmatprep.subr.bf16.mxu1 (!%p598_p9), %v4650_v9  ;;  %4235 = vmatprep.subr.bf16.mxu0 (!%p598_p9), %v4650_v9  ;;  %v3987_v32 = vld [vmem:[%s5491_s8] ss:$0 sm:$0xff] (!%p598_p9)  ;;  %v4655_v44 = vmov (!%p598_p9), 1983009808  }
  0x1d   : > { %s5544_s6 = sld [smem:[#allocation17_spill]] (!%p598_p9)  ;;  %4223 = vmatprep.mubr.msk.bf16.mxu1 (!%p598_p9), %vm4651_vm1, %v4650_v9  ;;  %4239 = vmatprep.mubr.msk.bf16.mxu0 (!%p598_p9), %vm4651_vm1, %v4650_v9  ;;  %s5545_s22 = sld [smem:[#allocation13_spill]] (!%p598_p9)  ;;  %v4893_v42 = vshrl.u32 (!%p598_p9), %v667_v41, 7  ;;  %v4895_v43 = vand.u32 (!%p598_p9), 127, %v667_v41  ;;  %v911_v45 = vunpack.c.l.s4 (!%p598_p9), %v4655_v44  ;;  %v4656_v46 = vmov (!%p598_p9), 1934713408  }
  0x1e   : > { %s5546_s28 = sld [smem:[#allocation14_spill]] (!%p598_p9)  ;;  %s5547_s2 = sld [smem:[#allocation16_spill]] (!%p598_p9)  ;;  %v943_v47 = vunpack.c.l.s4 (!%p598_p9), %v4656_v46  ;;  %vm1344_vm3 = vcmask (!%p598_p9), 64512   ;;  %vm1584_vm4 = vcmask (!%p598_p9), 1043456   ;;  %vm1915_vm5 = vcmask (!%p598_p9), 130048  }
  0x1f   : > { %s5549_s7 = sld [smem:[#allocation18_spill]] (!%p598_p9)  ;;  %vm671_vm2 = vcmp.le.s32.totalorder (!%p598_p9), %v4895_v43, %v4893_v42  ;;  %v912_v48 = vunpack.c.0.s8 (!%p598_p9), %v911_v45  ;;  %s5517_s27 = smov (!%p598_p9), 8   ;;  %vm1917_vm6 = vcmask (!%p598_p9), 195584   ;;  %vm3821_vm7 = vcmask (!%p598_p9), 253952  }
  0x20   : > { %v944_v51 = vunpack.c.0.s8 (!%p598_p9), %v943_v47  ;;  %s5516_s30 = smov (!%p598_p9), 24   ;;  %s5551_s24 = smov (!%p598_p9), 120   ;;  %vm3897_vm8 = vcmask (!%p598_p9), 122880  }
  0x21   : > { %v4900_v52 = vsub.s32 (!%p598_p9), %v912_v48, %v4893_v42  ;;  %s5552_s26 = smov (!%p598_p9), 104  }
  0x22   : > { %v4498_v7 = vld [vmem:[%s5543_s29] sm:$0xff] (!%p598_p9)   ;;  %v4500_v10 = vld [vmem:[%s5543_s29 + $0x8] sm:$0xff] (!%p598_p9)   ;;  %v4903_v58 = vsub.s32 (!%p598_p9), %v944_v51, %v4893_v42 }
  0x23   : > { %s4822_s23 = scalar_select %p658_p10, %s4793_s3, 1  ;;  %v4499_v8 = vld [vmem:[%s5544_s6] sm:$0xff]   ;;  %4220 = vmatpush3.bf16.msra.mxu1 %v4498_v7  ;;  %v4501_v11 = vld [vmem:[%s5544_s6 + $0x8] sm:$0xff]  }
  0x24   : > { %4236 = vmatpush3.bf16.msra.mxu0 %v4499_v8  ;;  %4221 = vmatprep.subr.bf16.mxu1 %v4650_v9  ;;  %v3981_v16 = vld [vmem:[%s5545_s22] ss:$0 sm:$0xff]  ;;  %s5548_s21 = smov %s5547_s2 }
  0x25   : > { %s3980_s1 = sshll.u32 %s4822_s23, 3  ;;  %4237 = vmatprep.subr.bf16.mxu0 %v4650_v9  ;;  %v3982_v18 = vld [vmem:[%s5546_s28] ss:$0 sm:$0xff]  ;;  %v4503_v23 = vld [vmem:[%s5548_s21 + $0x8] sm:$0xff]  }
  0x26   : > { %s661_s4 = scalar_lea.vmem %s5542_s0, %s3980_s1  ;;  %v4502_v21 = vld [vmem:[%s5547_s2] sm:$0xff]   ;;  %s5519_s1 = smov 104  }
  0x27   : > { %v4828_v0 = vld [vmem:[%s661_s4] sm:$0xff]  ;;  %4222 = vmatpush3.bf16.msra.mxu1 %v4500_v10  ;;  %s5521_s0 = smov 120   ;;  %s5523_s4 = smov 112  }
  0x28   : > { %v676_v1 = vsel %vm675_vm0, %v4828_v0, 0.0  ;;  %4238 = vmatpush3.bf16.msra.mxu0 %v4501_v11  ;;  %4227 = vmatprep.subr.bf16.mxu1 %v4650_v9  ;;  %v3983_v36 = vld [vmem:[%s5549_s7] ss:$0 sm:$0xff]  ;;  %s5518_s2 = smov 16  }
  0x29   : > { %677 = vadd.xlane.f32.xlu0 %v676_v1  ;;  %4249 = vmatprep.subr.bf16.mxu0 %v4650_v9 }
  0xb6   : > { %v678_v2 = vpop.xlane.xlu0 %677 }
  0xb7   : > { %v680_v3 = vmul.f32 0.03125, %v678_v2 }
  0xb9   : > { %v681_v4 = vsub.f32 %v4828_v0, %v680_v3 }
  0xbb   : > { %v682_v5 = vmul.f32 %v681_v4, %v681_v4 }
  0xbd   : > { %v683_v6 = vsel %vm675_vm0, %v682_v5, 0.0 }
  0xbe   : > { %684 = vadd.xlane.f32.xlu0 %v683_v6 }
 0x14b   : > { %v685_v12 = vpop.xlane.xlu0 %684 }
 0x14c   : > { %v686_v13 = vmul.f32 0.03125, %v685_v12 }
 0x14e   : > { %v687_v14 = vadd.f32 1e-05, %v686_v13 }
 0x150   : > { %4536 = vrsqrt.f32 %v687_v14 }
 0x15a   : > { %v4537_v15 = vpop.eup %4536 }
 0x15b   : > { %v689_v17 = vmul.f32 %v4537_v15, %v681_v4 }
 0x15d   : > { %v696_v19 = vmul.f32 %v3981_v16, %v689_v17 }
 0x15f   : > { %v703_v20 = vadd.f32 %v3982_v18, %v696_v19 }
 0x161   : > { %v704_v22 = vpack.c.bf16 %v703_v20, %v703_v20 }
 0x163   : > { %4224 = vmatmul.mubr.msk.bf16.vlgmr.msra.gmra.mrb[0].mxu1 %vm675_vm0, %v704_v22  ;;  %4240 = vmatmul.mubr.msk.bf16.vlgmr.msra.gmra.mrb[0].mxu0 %vm675_vm0, %v704_v22 }
 0x164   : > { %4228 = vmatpush3.bf16.msra.mxu1 %v4502_v21  ;;  %4231 = vmatprep.mubr.msk.bf16.mxu1 %vm4651_vm1, %v4650_v9 }
 0x165   : > { %4229 = vmatprep.subr.bf16.mxu1 %v4650_v9  ;;  %4251 = vmatprep.mubr.msk.bf16.mxu0 %vm4651_vm1, %v4650_v9 }
 0x168   : > { %4230 = vmatpush3.bf16.msra.mxu1 %v4503_v23 }
 0x169   : > { %4243 = vmatprep.subr.bf16.mxu1 %v4650_v9 }
 0x16b   : > { %4232 = vmatmul.mubr.msk.bf16.vlgmr.msra.gmra.mrb[4].mxu1 %vm675_vm0, %v704_v22 }
 0x16c   : > { %4245 = vmatprep.mubr.msk.bf16.mxu1 %vm4651_vm1, %v4650_v9 }
 0x236   : > { %v765_v24 = vpop.f32.mrb[0].mxu1  ;;  %v4879_v25 = vpop.f32.mrb[0].mxu0 }
 0x237   : > { %v4225_v26 = vpop.f32.mrb[1].mxu1  ;;  %v4241_v27 = vpop.f32.mrb[1].mxu0  ;;  %v766_v39 = vadd.f32 %v3983_v36, %v765_v24 }
 0x238   : > { %v768_v28 = vpop.f32.mrb[2].mxu1  ;;  %v894_v29 = vpop.f32.mrb[2].mxu0 }
 0x239   : > { %v4226_v30 = vpop.f32.mrb[3].mxu1  ;;  %v4242_v31 = vpop.f32.mrb[3].mxu0  ;;  %v897_v40 = vmul.f32 0.35355338, %v766_v39 }
 0x23e   : > { %v828_v33 = vpop.f32.mrb[4].mxu1 }
 0x23f   : > { %v829_v34 = vadd.f32 %v3987_v32, %v828_v33  ;;  %v4233_v35 = vpop.f32.mrb[5].mxu1 }
 0x240   : > { %v831_v37 = vpop.f32.mrb[6].mxu1 }
 0x241   : > { %1051 = vrot.lane.b32.xlu0 %v829_v34, %s5519_s1  ;;  %1045 = vrot.lane.b32.xlu1 %v829_v34, %s5521_s0  ;;  %v4234_v38 = vpop.f32.mrb[7].mxu1 }
 0x245   : > { %1048 = vrot.lane.b32.xlu1 %v829_v34, %s5523_s4 }
 0x249   : > { %899 = vrot.lane.b32.xlu1 %v897_v40, %s5521_s0 }
 0x24d   : > { %902 = vrot.lane.b32.xlu1 %v897_v40, %s5523_s4 }
 0x251   : > { %905 = vrot.lane.b32.xlu1 %v897_v40, %s5519_s1 }
 0x2b3   : > { %v1052_v49 = vpop.permute.xlu0 %1051  ;;  %v1046_v50 = vpop.permute.xlu1 %1045 }
 0x2b4   : > { %v1070_v53 = vcombine.low %v1046_v50, %v1052_v49  ;;  %v1071_v54 = vcombine.high %v1046_v50, %v1052_v49 }
 0x2b6   : > { %v1078_v59 = vrot.slane %v1070_v53, %v4900_v52  ;;  %v1085_v60 = vrot.slane %v1071_v54, %v4900_v52 }
 0x2b7   : > { %v1049_v55 = vpop.permute.xlu1 %1048 }
 0x2b8   : > { %v1054_v56 = vcombine.low %v829_v34, %v1049_v55  ;;  %v1055_v57 = vcombine.high %v829_v34, %v1049_v55 }
 0x2ba   : > { %v1062_v61 = vrot.slane %v1054_v56, %v4900_v52  ;;  %v1069_v62 = vrot.slane %v1055_v57, %v4900_v52 }
 0x2bb   : > { %v900_v63 = vpop.permute.xlu1 %899 }
 0x2bc   : > { %v1086_v1 = vcombine.low %v1062_v61, %v1078_v59  ;;  %v1087_v2 = vcombine.high %v1062_v61, %v1078_v59  ;;  %v1102_v3 = vcombine.low %v1069_v62, %v1085_v60  ;;  %v1103_v4 = vcombine.high %v1069_v62, %v1085_v60 }
 0x2be   : > { %v1094_v5 = vrot.slane %v1086_v1, %v4903_v58  ;;  %v1101_v6 = vrot.slane %v1087_v2, %v4903_v58  ;;  %v1110_v7 = vrot.slane %v1102_v3, %v4903_v58  ;;  %v1117_v8 = vrot.slane %v1103_v4, %v4903_v58 }
 0x2bf   : > { %v903_v10 = vpop.permute.xlu1 %902 }
 0x2c0   : > { %v1122_v11 = vcombine.low %v1094_v5, %v1101_v6  ;;  %v3997_v12 = vcombine.high %v1094_v5, %v1101_v6  ;;  %v1138_v13 = vcombine.low %v1110_v7, %v1117_v8  ;;  %v3998_v14 = vcombine.high %v1110_v7, %v1117_v8 }
 0x2c1   : > { %v908_v15 = vcombine.low %v897_v40, %v903_v10  ;;  %v909_v16 = vcombine.high %v897_v40, %v903_v10 }
 0x2c2   : > { %v1129_v17 = vrot.slane %v1122_v11, %v4900_v52  ;;  %v1137_v18 = vrot.slane %v3997_v12, %v4900_v52  ;;  %v1145_v19 = vrot.slane %v1138_v13, %v4900_v52  ;;  %v1153_v20 = vrot.slane %v3998_v14, %v4900_v52 }
 0x2c3   : > { %v906_v21 = vpop.permute.xlu1 %905  ;;  %v916_v27 = vrot.slane %v908_v15, %v4900_v52  ;;  %v923_v28 = vrot.slane %v909_v16, %v4900_v52 }
 0x2c4   : > { %v924_v22 = vcombine.low %v900_v63, %v906_v21  ;;  %v925_v23 = vcombine.high %v900_v63, %v906_v21  ;;  %v1154_v24 = vcombine.low %v1129_v17, %v1137_v18  ;;  %v1170_v26 = vcombine.low %v1145_v19, %v1153_v20 }
 0x2c5   : > { %v1155_v33 = vcombine.high %v1129_v17, %v1137_v18  ;;  %v1171_v34 = vcombine.high %v1145_v19, %v1153_v20 }
 0x2c6   : > { %v932_v29 = vrot.slane %v924_v22, %v4900_v52  ;;  %v939_v30 = vrot.slane %v925_v23, %v4900_v52  ;;  %v1162_v31 = vrot.slane %v1154_v24, %v4903_v58  ;;  %v1178_v32 = vrot.slane %v1170_v26, %v4903_v58 }
 0x2c7   : > { %v1169_v49 = vrot.slane %v1155_v33, %v4903_v58  ;;  %v1185_v50 = vrot.slane %v1171_v34, %v4903_v58  ;;  %v4657_v23 = vmov -1e+30  }
 0x2c8   : > { %v940_v35 = vcombine.low %v916_v27, %v932_v29  ;;  %v941_v36 = vcombine.high %v916_v27, %v932_v29  ;;  %v956_v37 = vcombine.low %v923_v28, %v939_v30  ;;  %v957_v38 = vcombine.high %v923_v28, %v939_v30 }
 0x2c9   : > { %v1186_v39 = vcombine.low %v1162_v31, %v1178_v32  ;;  %v1187_v40 = vcombine.high %v1162_v31, %v1178_v32  ;;  %v1188_v2 = vcombine.low %v1169_v49, %v1185_v50  ;;  %v1189_v3 = vcombine.high %v1169_v49, %v1185_v50  ;;  %v3991_v50 = vld [vmem:[%s5492_s9] ss:$0 sm:$0xff] }
 0x2ca   : > { %v948_v41 = vrot.slane %v940_v35, %v4903_v58  ;;  %v955_v44 = vrot.slane %v941_v36, %v4903_v58  ;;  %v964_v45 = vrot.slane %v956_v37, %v4903_v58  ;;  %v971_v46 = vrot.slane %v957_v38, %v4903_v58 }
 0x2cb   : > { %v1340_v47 = vpack.c.bf16 %v1186_v39, %v1186_v39  ;;  %v1341_v48 = vpack.c.bf16 %v1187_v40, %v1187_v40  ;;  %v1342_v11 = vpack.c.bf16 %v1188_v2, %v1188_v2  ;;  %v1343_v12 = vpack.c.bf16 %v1189_v3, %v1189_v3 }
 0x2cc   : > { %v976_v51 = vcombine.low %v948_v41, %v955_v44  ;;  %v3995_v53 = vcombine.high %v948_v41, %v955_v44  ;;  %v992_v54 = vcombine.low %v964_v45, %v971_v46  ;;  %v3996_v55 = vcombine.high %v964_v45, %v971_v46 }
 0x2cd   : > { %v1349_v56 = vsel %vm1344_vm3, %v1340_v47, 0  ;;  %v1395_v57 = vsel %vm1344_vm3, %v1341_v48, 0  ;;  %v1441_v17 = vsel %vm1344_vm3, %v1342_v11, 0  ;;  %v1487_v18 = vsel %vm1344_vm3, %v1343_v12, 0 }
 0x2ce   : > { %v983_v59 = vrot.slane %v976_v51, %v4900_v52  ;;  %v991_v60 = vrot.slane %v3995_v53, %v4900_v52  ;;  %v999_v61 = vrot.slane %v992_v54, %v4900_v52  ;;  %v1007_v62 = vrot.slane %v3996_v55, %v4900_v52  ;;  %4244 = vmatpush3.bf16.xpose.msra.mxu1 %v1349_v56 }
 0x2cf   : > { %4250 = vmatpush3.bf16.xpose.msra.mxu0 %v1395_v57  ;;  %4255 = vmatprep.subr.bf16.mxu1 %v4650_v9  ;;  %v4960_v24 = vsel %vm671_vm2, 0.0, %v4657_v23  ;;  %v892_v51 = vadd.f32 %v3991_v50, %v4879_v25 }
 0x2d0   : > { %v1008_v63 = vcombine.low %v983_v59, %v991_v60  ;;  %v1024_v1 = vcombine.low %v999_v61, %v1007_v62  ;;  %4261 = vmatprep.subr.bf16.mxu0 %v4650_v9  ;;  %v1009_v4 = vcombine.high %v983_v59, %v991_v60  ;;  %v1025_v5 = vcombine.high %v999_v61, %v1007_v62 }
 0x2d2   : > { %v1016_v6 = vrot.slane %v1008_v63, %v4903_v58  ;;  %v1032_v7 = vrot.slane %v1024_v1, %v4903_v58  ;;  %v1023_v15 = vrot.slane %v1009_v4, %v4903_v58  ;;  %v1039_v16 = vrot.slane %v1025_v5, %v4903_v58 }
 0x2d4   : > { %v1040_v8 = vcombine.low %v1016_v6, %v1032_v7  ;;  %v1041_v10 = vcombine.high %v1016_v6, %v1032_v7  ;;  %v1042_v19 = vcombine.low %v1023_v15, %v1039_v16  ;;  %v1043_v20 = vcombine.high %v1023_v15, %v1039_v16 }
 0x2d6   : > { %v1336_v13 = vpack.c.bf16 %v1040_v8, %v1040_v8  ;;  %v1337_v14 = vpack.c.bf16 %v1041_v10, %v1041_v10  ;;  %v1338_v21 = vpack.c.bf16 %v1042_v19, %v1042_v19  ;;  %v1339_v22 = vpack.c.bf16 %v1043_v20, %v1043_v20 }
 0x2d8   : > { %4246 = vmatmul.mubr.msk.bf16.vlgmr.msra.gmra.mrb[8].mxu1 %vm1344_vm3, %v1336_v13  ;;  %4252 = vmatmul.mubr.msk.bf16.vlgmr.msra.gmra.mrb[4].mxu0 %vm1344_vm3, %v1337_v14 }
 0x2d9   : > { %4256 = vmatpush3.bf16.xpose.msra.mxu1 %v1441_v17  ;;  %4262 = vmatpush3.bf16.xpose.msra.mxu0 %v1487_v18 }
 0x2da   : > { %4257 = vmatprep.mubr.msk.bf16.mxu1 %vm4651_vm1, %v4650_v9  ;;  %4263 = vmatprep.mubr.msk.bf16.mxu0 %vm4651_vm1, %v4650_v9 }
 0x2db   : > { %4267 = vmatprep.subr.bf16.mxu1 %v4650_v9  ;;  %4273 = vmatprep.subr.bf16.mxu0 %v4650_v9 }
 0x2e0   : > { %4258 = vmatmul.mubr.msk.bf16.vlgmr.msra.gmra.mrb[12].mxu1 %vm1344_vm3, %v1338_v21  ;;  %4264 = vmatmul.mubr.msk.bf16.vlgmr.msra.gmra.mrb[8].mxu0 %vm1344_vm3, %v1339_v22 }
 0x2e1   : > { %4269 = vmatprep.mubr.msk.bf16.mxu1 %vm4651_vm1, %v4650_v9  ;;  %4275 = vmatprep.mubr.msk.bf16.mxu0 %vm4651_vm1, %v4650_v9 }
 0x3ab   : > { %v1385_v26 = vpop.f32.mrb[8].mxu1  ;;  %v1431_v27 = vpop.f32.mrb[4].mxu0 }
 0x3ac   : > { %v1386_v28 = vadd.f32 %v1385_v26, %v4960_v24  ;;  %v1432_v29 = vadd.f32 %v1431_v27, %v4960_v24  ;;  %v4247_v30 = vpop.f32.mrb[9].mxu1  ;;  %v4253_v31 = vpop.f32.mrb[5].mxu0 }
 0x3ad   : > { %v1388_v32 = vpop.f32.mrb[10].mxu1  ;;  %v1434_v33 = vpop.f32.mrb[6].mxu0 }
 0x3ae   : > { %v4248_v34 = vpop.f32.mrb[11].mxu1  ;;  %v4254_v35 = vpop.f32.mrb[7].mxu0  ;;  %v1532_v36 = vsel %vm1344_vm3, %v1432_v29, -inf  ;;  %v1529_v37 = vsel %vm1344_vm3, %v1386_v28, -inf }
 0x3af   : > { %1533 = vmax.xlane.f32.xlu0 %v1532_v36  ;;  %1530 = vmax.xlane.f32.xlu1 %v1529_v37 }
 0x3b3   : > { %v1477_v42 = vpop.f32.mrb[12].mxu1  ;;  %v1523_v43 = vpop.f32.mrb[8].mxu0 }
 0x3b4   : > { %v1478_v38 = vadd.f32 %v1477_v42, %v4960_v24  ;;  %v4259_v39 = vpop.f32.mrb[13].mxu1  ;;  %v4265_v40 = vpop.f32.mrb[9].mxu0  ;;  %v1524_v45 = vadd.f32 %v1523_v43, %v4960_v24 }
 0x3b5   : > { %v1480_v41 = vpop.f32.mrb[14].mxu1  ;;  %v1526_v44 = vpop.f32.mrb[10].mxu0 }
 0x3b6   : > { %v4260_v46 = vpop.f32.mrb[15].mxu1  ;;  %v4266_v47 = vpop.f32.mrb[11].mxu0  ;;  %v1535_v48 = vsel %vm1344_vm3, %v1478_v38, -inf  ;;  %v1538_v49 = vsel %vm1344_vm3, %v1524_v45, -inf }
 0x3b7   : > { %1536 = vmax.xlane.f32.xlu1 %v1535_v48 }
 0x3bb   : > { %1539 = vmax.xlane.f32.xlu1 %v1538_v49 }
 0x3cc   : > { %1194 = vrot.lane.b32.xlu1 %v892_v51, %s5523_s4  ;;  %s5556_s4 = sld [smem:[#allocation12_spill]] }
 0x43c   : > { %v1534_v53 = vpop.xlane.xlu0 %1533  ;;  %v1531_v54 = vpop.xlane.xlu1 %1530 }
 0x43d   : > { %v1542_v55 = vsub.f32 %v1432_v29, %v1534_v53  ;;  %v1541_v56 = vsub.f32 %v1386_v28, %v1531_v54 }
 0x43f   : > { %v1547_v57 = vmul.f32 1.442695, %v1542_v55  ;;  %v1545_v59 = vmul.f32 1.442695, %v1541_v56 }
 0x441   : > { %4538 = vpow2.f32 %v1547_v57 }
 0x442   : > { %4540 = vpow2.f32 %v1545_v59 }
 0x444   : > { %v1537_v63 = vpop.xlane.xlu1 %1536 }
 0x445   : > { %v1543_v3 = vsub.f32 %v1478_v38, %v1537_v63 }
 0x447   : > { %v1549_v5 = vmul.f32 1.442695, %v1543_v3 }
 0x448   : > { %v1540_v1 = vpop.xlane.xlu1 %1539 }
 0x449   : > { %v1544_v2 = vsub.f32 %v1524_v45, %v1540_v1 }
 0x44b   : > { %v4975_v60 = vpop.eup %4538  ;;  %v1551_v4 = vmul.f32 1.442695, %v1544_v2 }
 0x44c   : > { %v4977_v61 = vpop.eup %4540  ;;  %v1556_v62 = vsel %vm1344_vm3, %v4975_v60, 0.0  ;;  %v1195_v11 = vpop.permute.xlu1 %1194 }
 0x44d   : > { %v1553_v25 = vsel %vm1344_vm3, %v4977_v61, 0.0  ;;  %1557 = vadd.xlane.f32.xlu1 %v1556_v62  ;;  %4542 = vpow2.f32 %v1551_v4  ;;  %v1200_v14 = vcombine.low %v892_v51, %v1195_v11  ;;  %v1201_v15 = vcombine.high %v892_v51, %v1195_v11 }
 0x44e   : > { %1554 = vadd.xlane.f32.xlu0 %v1553_v25  ;;  %4544 = vpow2.f32 %v1549_v5 }
 0x44f   : > { %v1208_v20 = vrot.slane %v1200_v14, %v4900_v52  ;;  %v1215_v21 = vrot.slane %v1201_v15, %v4900_v52 }
 0x457   : > { %v4985_v6 = vpop.eup %4542 }
 0x458   : > { %v4987_v7 = vpop.eup %4544  ;;  %v1562_v8 = vsel %vm1344_vm3, %v4985_v6, 0.0 }
 0x459   : > { %v1559_v10 = vsel %vm1344_vm3, %v4987_v7, 0.0 }
 0x45e   : > { %1197 = vrot.lane.b32.xlu1 %v892_v51, %s5519_s1 }
 0x464   : > { %1191 = vrot.lane.b32.xlu0 %v892_v51, %s5521_s0  ;;  %s5555_s0 = smov 24  }
 0x482   : > { %1563 = vadd.xlane.f32.xlu1 %v1562_v8 }
 0x483   : > { %1560 = vadd.xlane.f32.xlu0 %v1559_v10 }
 0x4da   : > { %v1558_v12 = vpop.xlane.xlu1 %1557 }
 0x4db   : > { %v1555_v13 = vpop.xlane.xlu0 %1554  ;;  %4546 = vrcp.f32 %v1558_v12 }
 0x4dc   : > { %4548 = vrcp.f32 %v1555_v13 }
 0x4de   : > { %v1198_v16 = vpop.permute.xlu1 %1197 }
 0x4df   : > { %v1192_v17 = vpop.permute.xlu0 %1191 }
 0x4e0   : > { %v1216_v18 = vcombine.low %v1192_v17, %v1198_v16  ;;  %v1217_v19 = vcombine.high %v1192_v17, %v1198_v16 }
 0x4e2   : > { %v1224_v22 = vrot.slane %v1216_v18, %v4900_v52  ;;  %v1231_v23 = vrot.slane %v1217_v19, %v4900_v52 }
 0x4e4   : > { %v1232_v26 = vcombine.low %v1208_v20, %v1224_v22  ;;  %v1233_v27 = vcombine.high %v1208_v20, %v1224_v22  ;;  %v1248_v28 = vcombine.low %v1215_v21, %v1231_v23  ;;  %v1249_v29 = vcombine.high %v1215_v21, %v1231_v23 }
 0x4e5   : > { %v4547_v48 = vpop.eup %4546 }
 0x4e6   : > { %v1240_v30 = vrot.slane %v1232_v26, %v4903_v58  ;;  %v1247_v31 = vrot.slane %v1233_v27, %v4903_v58  ;;  %v1256_v32 = vrot.slane %v1248_v28, %v4903_v58  ;;  %v1263_v33 = vrot.slane %v1249_v29, %v4903_v58  ;;  %v4549_v51 = vpop.eup %4548 }
 0x4e7   : > { %v1569_v57 = vmul.f32 %v4549_v51, %v4977_v61  ;;  %v1570_v59 = vmul.f32 %v4547_v48, %v4975_v60 }
 0x4e8   : > { %v1268_v34 = vcombine.low %v1240_v30, %v1247_v31  ;;  %v3999_v35 = vcombine.high %v1240_v30, %v1247_v31  ;;  %v1284_v36 = vcombine.low %v1256_v32, %v1263_v33  ;;  %v4000_v37 = vcombine.high %v1256_v32, %v1263_v33 }
 0x4e9   : > { %v1573_v4 = vpack.c.bf16 %v1569_v57, %v1569_v57  ;;  %v1574_v5 = vpack.c.bf16 %v1570_v59, %v1570_v59 }
 0x4ea   : > { %v1275_v42 = vrot.slane %v1268_v34, %v4900_v52  ;;  %v1283_v43 = vrot.slane %v3999_v35, %v4900_v52  ;;  %v1291_v38 = vrot.slane %v1284_v36, %v4900_v52  ;;  %v1299_v39 = vrot.slane %v4000_v37, %v4900_v52 }
 0x4ec   : > { %v1300_v40 = vcombine.low %v1275_v42, %v1283_v43  ;;  %v1301_v41 = vcombine.high %v1275_v42, %v1283_v43  ;;  %v1316_v44 = vcombine.low %v1291_v38, %v1299_v39  ;;  %v1317_v45 = vcombine.high %v1291_v38, %v1299_v39 }
 0x4ee   : > { %v1308_v46 = vrot.slane %v1300_v40, %v4903_v58  ;;  %v1315_v47 = vrot.slane %v1301_v41, %v4903_v58  ;;  %v1324_v49 = vrot.slane %v1316_v44, %v4903_v58  ;;  %v1331_v50 = vrot.slane %v1317_v45, %v4903_v58  ;;  %v4504_v45 = vld [vmem:[%s5493_s10] sm:$0xff]  }
 0x4f0   : > { %v1332_v53 = vcombine.low %v1308_v46, %v1324_v49  ;;  %v1333_v54 = vcombine.high %v1308_v46, %v1324_v49  ;;  %v1334_v55 = vcombine.low %v1315_v47, %v1331_v50  ;;  %v1335_v56 = vcombine.high %v1315_v47, %v1331_v50 }
 0x4f2   : > { %v1577_v62 = vpack.c.bf16 %v1332_v53, %v1332_v53  ;;  %v1578_v25 = vpack.c.bf16 %v1333_v54, %v1333_v54  ;;  %v1579_v2 = vpack.c.bf16 %v1334_v55, %v1334_v55  ;;  %v1580_v3 = vpack.c.bf16 %v1335_v56, %v1335_v56  ;;  %v4505_v55 = vld [vmem:[%s5493_s10 + $0x8] sm:$0xff]  }
 0x4f4   : > { %v1586_v63 = vsel %vm1584_vm4, %v1577_v62, 0  ;;  %v1632_v1 = vsel %vm1584_vm4, %v1578_v25, 0  ;;  %v1678_v60 = vsel %vm1584_vm4, %v1579_v2, 0  ;;  %v1724_v61 = vsel %vm1584_vm4, %v1580_v3, 0 }
 0x4f5   : > { %4268 = vmatpush3.bf16.msra.mxu1 %v1586_v63  ;;  %4274 = vmatpush3.bf16.msra.mxu0 %v1632_v1 }
 0x4f6   : > { %4279 = vmatprep.subr.bf16.mxu1 %v4650_v9  ;;  %4285 = vmatprep.subr.bf16.mxu0 %v4650_v9 }
 0x4f8   : > { %4270 = vmatmul.mubr.msk.bf16.vlgmr.msra.gmra.mrb[16].mxu1 %vm1344_vm3, %v1573_v4  ;;  %4276 = vmatmul.mubr.msk.bf16.vlgmr.msra.gmra.mrb[12].mxu0 %vm1344_vm3, %v1574_v5 }
 0x4f9   : > { %4280 = vmatpush3.bf16.msra.mxu1 %v1678_v60  ;;  %4286 = vmatpush3.bf16.msra.mxu0 %v1724_v61 }
 0x4fa   : > { %4281 = vmatprep.mubr.msk.bf16.mxu1 %vm4651_vm1, %v4650_v9  ;;  %4287 = vmatprep.mubr.msk.bf16.mxu0 %vm4651_vm1, %v4650_v9 }
 0x4fb   : > { %4291 = vmatprep.subr.bf16.mxu1 %v4650_v9  ;;  %4299 = vmatprep.subr.bf16.mxu0 %v4650_v9 }
 0x50f   : > { %v1564_v8 = vpop.xlane.xlu1 %1563 }
 0x510   : > { %v1561_v10 = vpop.xlane.xlu0 %1560  ;;  %4550 = vrcp.f32 %v1564_v8 }
 0x511   : > { %4552 = vrcp.f32 %v1561_v10 }
 0x51a   : > { %v4551_v11 = vpop.eup %4550 }
 0x51b   : > { %v4553_v12 = vpop.eup %4552  ;;  %v1572_v13 = vmul.f32 %v4551_v11, %v4985_v6 }
 0x51c   : > { %v1571_v14 = vmul.f32 %v4553_v12, %v4987_v7 }
 0x51d   : > { %v1576_v15 = vpack.c.bf16 %v1572_v13, %v1572_v13 }
 0x51e   : > { %v1575_v16 = vpack.c.bf16 %v1571_v14, %v1571_v14 }
 0x51f   : > { %4288 = vmatmul.mubr.msk.bf16.vlgmr.msra.gmra.mrb[16].mxu0 %vm1344_vm3, %v1576_v15 }
 0x520   : > { %4282 = vmatmul.mubr.msk.bf16.vlgmr.msra.gmra.mrb[20].mxu1 %vm1344_vm3, %v1575_v16  ;;  %4303 = vmatprep.mubr.msk.bf16.mxu0 %vm4651_vm1, %v4650_v9 }
 0x521   : > { %4295 = vmatprep.mubr.msk.bf16.mxu1 %vm4651_vm1, %v4650_v9  ;;  %4292 = vmatpush3.bf16.msra.mxu1 %v4504_v45  ;;  %v4510_v45 = vld [vmem:[%s5499_s16 + $0x10] sm:$0xff]  }
 0x522   : > { %4293 = vmatprep.subr.bf16.mxu1 %v4650_v9 }
 0x525   : > { %4294 = vmatpush3.bf16.msra.mxu1 %v4505_v55 }
 0x526   : > { %4307 = vmatprep.subr.bf16.mxu1 %v4650_v9 }
 0x5cb   : > { %v1622_v17 = vpop.f32.mrb[16].mxu1  ;;  %v1668_v18 = vpop.f32.mrb[12].mxu0 }
 0x5cc   : > { %v4271_v19 = vpop.f32.mrb[17].mxu1  ;;  %v4277_v20 = vpop.f32.mrb[13].mxu0 }
 0x5cd   : > { %v1625_v21 = vpop.f32.mrb[18].mxu1  ;;  %v1671_v6 = vpop.f32.mrb[14].mxu0  ;;  %v4011_v19 = vld [vmem:[%s5494_s11] ss:$0 sm:$0xff] }
 0x5ce   : > { %v4272_v22 = vpop.f32.mrb[19].mxu1  ;;  %v4278_v7 = vpop.f32.mrb[15].mxu0 }
 0x5f2   : > { %v1760_v23 = vpop.f32.mrb[16].mxu0 }
 0x5f3   : > { %v1714_v26 = vpop.f32.mrb[20].mxu1  ;;  %v1782_v27 = vcombine.low %v1668_v18, %v1760_v23  ;;  %v1783_v28 = vcombine.high %v1668_v18, %v1760_v23  ;;  %v4289_v29 = vpop.f32.mrb[17].mxu0 }
 0x5f4   : > { %v1766_v30 = vcombine.low %v1622_v17, %v1714_v26  ;;  %v1767_v31 = vcombine.high %v1622_v17, %v1714_v26  ;;  %v4283_v32 = vpop.f32.mrb[21].mxu1  ;;  %v1763_v33 = vpop.f32.mrb[18].mxu0 }
 0x5f5   : > { %v1790_v34 = vrot.slane %v1782_v27, %v4900_v52  ;;  %v1797_v35 = vrot.slane %v1783_v28, %v4900_v52  ;;  %v1717_v36 = vpop.f32.mrb[22].mxu1  ;;  %v4290_v37 = vpop.f32.mrb[19].mxu0  ;;  %v4506_v32 = vld [vmem:[%s5497_s14] sm:$0xff]  }
 0x5f6   : > { %v1774_v42 = vrot.slane %v1766_v30, %v4900_v52  ;;  %v1781_v43 = vrot.slane %v1767_v31, %v4900_v52  ;;  %v4284_v38 = vpop.f32.mrb[23].mxu1  ;;  %4300 = vmatpush3.bf16.msra.mxu0 %v4506_v32  ;;  %v4015_v37 = vld [vmem:[%s5495_s12] ss:$0 sm:$0xff]  ;;  %v4520_v32 = vld [vmem:[%s5544_s6 + $0x10] sm:$0xff]  }
 0x5f7   : > { %4301 = vmatprep.subr.bf16.mxu0 %v4650_v9 }
 0x5f8   : > { %v1798_v39 = vcombine.low %v1774_v42, %v1790_v34  ;;  %v1799_v40 = vcombine.high %v1774_v42, %v1790_v34  ;;  %v1814_v41 = vcombine.low %v1781_v43, %v1797_v35  ;;  %v1815_v44 = vcombine.high %v1781_v43, %v1797_v35  ;;  %v4016_v43 = vld [vmem:[%s5496_s13] ss:$0 sm:$0xff] }
 0x5fa   : > { %v1806_v46 = vrot.slane %v1798_v39, %v4903_v58  ;;  %v1813_v47 = vrot.slane %v1799_v40, %v4903_v58  ;;  %v1822_v48 = vrot.slane %v1814_v41, %v4903_v58  ;;  %v1829_v49 = vrot.slane %v1815_v44, %v4903_v58  ;;  %v4508_v41 = vld [vmem:[%s5499_s16] sm:$0xff]   ;;  %v4509_v44 = vld [vmem:[%s5499_s16 + $0x8] sm:$0xff]  }
 0x5fc   : > { %v1834_v50 = vcombine.low %v1806_v46, %v1813_v47  ;;  %v4009_v51 = vcombine.high %v1806_v46, %v1813_v47  ;;  %v1850_v53 = vcombine.low %v1822_v48, %v1829_v49  ;;  %v4010_v54 = vcombine.high %v1822_v48, %v1829_v49  ;;  %v4511_v46 = vld [vmem:[%s5499_s16 + $0x18] sm:$0xff]   ;;  %v4512_v47 = vld [vmem:[%s5499_s16 + $0x20] sm:$0xff]   ;;  %v4513_v48 = vld [vmem:[%s5499_s16 + $0x28] sm:$0xff]  }
 0x5fd   : > { %v4514_v49 = vld [vmem:[%s5499_s16 + $0x30] sm:$0xff]  }
 0x5fe   : > { %v1841_v56 = vrot.slane %v1834_v50, %v4900_v52  ;;  %v1849_v57 = vrot.slane %v4009_v51, %v4900_v52  ;;  %v1857_v59 = vrot.slane %v1850_v53, %v4900_v52  ;;  %v1865_v62 = vrot.slane %v4010_v54, %v4900_v52  ;;  %v4515_v50 = vld [vmem:[%s5499_s16 + $0x38] sm:$0xff]   ;;  %v4017_v51 = vld [vmem:[%s5498_s15] ss:$0 sm:$0xff] }
 0x600   : > { %v1867_v25 = vcombine.high %v1841_v56, %v1849_v57  ;;  %v1883_v63 = vcombine.high %v1857_v59, %v1865_v62  ;;  %v1866_v1 = vcombine.low %v1841_v56, %v1849_v57  ;;  %v1882_v2 = vcombine.low %v1857_v59, %v1865_v62 }
 0x602   : > { %v1881_v3 = vrot.slane %v1867_v25, %v4903_v58  ;;  %v1897_v4 = vrot.slane %v1883_v63, %v4903_v58  ;;  %v1874_v5 = vrot.slane %v1866_v1, %v4903_v58  ;;  %v1890_v60 = vrot.slane %v1882_v2, %v4903_v58 }
 0x604   : > { %v1900_v61 = vcombine.low %v1881_v3, %v1897_v4  ;;  %v1899_v8 = vcombine.high %v1874_v5, %v1890_v60  ;;  %v1901_v10 = vcombine.high %v1881_v3, %v1897_v4  ;;  %v1898_v11 = vcombine.low %v1874_v5, %v1890_v60  ;;  %v4022_v4 = vld [vmem:[%s5500_s17] ss:$0 sm:$0xff] }
 0x606   : > { %1907 = vrot.lane.b32.xlu1 %v1900_v61, %s5518_s2  ;;  %1903 = vrot.lane.b32.xlu0 %v1899_v8, %s5517_s27  ;;  %s5550_s2 = smov 112   ;;  %s664_s27 = scalar_lea.vmem %s5556_s4, %s4822_s23 }
 0x607   : > { %s4131_s23 = sshll.u32 %s4793_s3, 4  ;;  %s4661_s3 = smov [#allocation2]  }
 0x60a   : > { %1911 = vrot.lane.b32.xlu0 %v1901_v10, %s5516_s30 }
 0x678   : > { %v1904_v12 = vpop.permute.xlu0 %1903  ;;  %v1908_v13 = vpop.permute.xlu1 %1907 }
 0x679   : > { %v1914_v14 = vsel %vm1344_vm3, %v1898_v11, %v1904_v12 }
 0x67a   : > { %v1916_v16 = vsel %vm1915_vm5, %v1914_v14, %v1908_v13 }
 0x67c   : > { %v1912_v15 = vpop.permute.xlu0 %1911 }
 0x67d   : > { %v1918_v17 = vsel %vm1917_vm6, %v1916_v16, %v1912_v15 }
 0x67e   : > { %v1919_v18 = vpack.c.bf16 %v1918_v17, %v1918_v17 }
 0x680   : > { %4296 = vmatmul.mubr.msk.bf16.vlgmr.msra.gmra.mrb[24].mxu1 %vm675_vm0, %v1919_v18  ;;  %v4516_v18 = vld [vmem:[%s5543_s29 + $0x10] sm:$0xff]  }
 0x681   : > { %4323 = vmatprep.mubr.msk.bf16.mxu1 %vm4651_vm1, %v4650_v9  ;;  %4308 = vmatpush3.bf16.msra.mxu1 %v4508_v41 }
 0x682   : > { %4309 = vmatprep.subr.bf16.mxu1 %v4650_v9 }
 0x685   : > { %4310 = vmatpush3.bf16.msra.mxu1 %v4509_v44 }
 0x686   : > { %4311 = vmatprep.subr.bf16.mxu1 %v4650_v9 }
 0x689   : > { %4312 = vmatpush3.bf16.msra.mxu1 %v4510_v45 }
 0x68a   : > { %4313 = vmatprep.subr.bf16.mxu1 %v4650_v9 }
 0x68d   : > { %4314 = vmatpush3.bf16.msra.mxu1 %v4511_v46 }
 0x68e   : > { %4315 = vmatprep.subr.bf16.mxu1 %v4650_v9 }
 0x691   : > { %4316 = vmatpush3.bf16.msra.mxu1 %v4512_v47 }
 0x692   : > { %4317 = vmatprep.subr.bf16.mxu1 %v4650_v9 }
 0x695   : > { %4318 = vmatpush3.bf16.msra.mxu1 %v4513_v48 }
 0x696   : > { %4319 = vmatprep.subr.bf16.mxu1 %v4650_v9 }
 0x699   : > { %4320 = vmatpush3.bf16.msra.mxu1 %v4514_v49 }
 0x69a   : > { %4321 = vmatprep.subr.bf16.mxu1 %v4650_v9 }
 0x69d   : > { %4322 = vmatpush3.bf16.msra.mxu1 %v4515_v50 }
 0x69e   : > { %4357 = vmatprep.subr.bf16.mxu1 %v4650_v9 }
 0x753   : > { %v1980_v20 = vpop.f32.mrb[24].mxu1 }
 0x754   : > { %v1981_v21 = vadd.f32 %v4011_v19, %v1980_v20  ;;  %v4297_v6 = vpop.f32.mrb[25].mxu1  ;;  %v4517_v19 = vld [vmem:[%s5543_s29 + $0x18] sm:$0xff]  }
 0x755   : > { %v1983_v22 = vpop.f32.mrb[26].mxu1 }
 0x756   : > { %v5070_v7 = vadd.f32 %v1981_v21, %v4828_v0  ;;  %v4298_v23 = vpop.f32.mrb[27].mxu1  ;;  %v4507_v0 = vld [vmem:[%s5497_s14 + $0x8] sm:$0xff]  }
 0x757   : > { %4302 = vmatpush3.bf16.msra.mxu0 %v4507_v0  ;;  %v4521_v0 = vld [vmem:[%s5544_s6 + $0x18] sm:$0xff]  }
 0x758   : > { %v1989_v26 = vsel %vm675_vm0, %v5070_v7, 0.0  ;;  %4327 = vmatprep.subr.bf16.mxu0 %v4650_v9 }
 0x759   : > { %1990 = vadd.xlane.f32.xlu1 %v1989_v26  ;;  %v4034_v26 = vld [vmem:[%s5546_s28 + $0x1] ss:$0 sm:$0xff] }
 0x7e6   : > { %v1991_v27 = vpop.xlane.xlu1 %1990 }
 0x7e7   : > { %v1992_v28 = vmul.f32 0.03125, %v1991_v27 }
 0x7e9   : > { %v1993_v29 = vsub.f32 %v5070_v7, %v1992_v28 }
 0x7eb   : > { %v1994_v30 = vmul.f32 %v1993_v29, %v1993_v29 }
 0x7ed   : > { %v1995_v31 = vsel %vm675_vm0, %v1994_v30, 0.0 }
 0x7ee   : > { %1996 = vadd.xlane.f32.xlu0 %v1995_v31  ;;  %v4519_v31 = vld [vmem:[%s5548_s21 + $0x18] sm:$0xff]  }
 0x87b   : > { %v1997_v33 = vpop.xlane.xlu0 %1996 }
 0x87c   : > { %v1998_v34 = vmul.f32 0.03125, %v1997_v33 }
 0x87e   : > { %v1999_v35 = vadd.f32 1e-05, %v1998_v34 }
 0x880   : > { %4554 = vrsqrt.f32 %v1999_v35 }
 0x88a   : > { %v4555_v36 = vpop.eup %4554 }
 0x88b   : > { %v2001_v42 = vmul.f32 %v4555_v36, %v1993_v29  ;;  %v4518_v29 = vld [vmem:[%s5548_s21 + $0x10] sm:$0xff]  }
 0x88d   : > { %v2008_v38 = vmul.f32 %v4015_v37, %v2001_v42  ;;  %v4040_v37 = vld [vmem:[%s5549_s7 + $0x1] ss:$0 sm:$0xff]  ;;  %s4590_s7 = sshll.u32 %s4661_s3, 4  ;;  %s4591_s7 = int_to_ptr.vmem [resolvable:$false] %s4590_s7 }
 0x88e   : > { %v4049_v42 = vld [vmem:[%s5491_s8 + $0x1] ss:$0 sm:$0xff]  ;;  %s4592_s6 = scalar_lea.vmem %s4591_s7, 32 }
 0x88f   : > { %v2015_v39 = vadd.f32 %v4016_v43, %v2008_v38 }
 0x891   : > { %v2016_v40 = vpack.c.bf16 %v2015_v39, %v2015_v39 }
 0x893   : > { %4304 = vmatmul.mubr.msk.bf16.vlgmr.msra.gmra.mrb[20].mxu0 %vm675_vm0, %v2016_v40 }
 0x894   : > { %4331 = vmatprep.mubr.msk.bf16.mxu0 %vm4651_vm1, %v4650_v9  ;;  %4328 = vmatpush3.bf16.msra.mxu0 %v4516_v18 }
 0x895   : > { %4329 = vmatprep.subr.bf16.mxu0 %v4650_v9 }
 0x898   : > { %4330 = vmatpush3.bf16.msra.mxu0 %v4517_v19 }
 0x899   : > { %4335 = vmatprep.subr.bf16.mxu0 %v4650_v9 }
 0x966   : > { %v2077_v53 = vpop.f32.mrb[20].mxu0 }
 0x967   : > { %v2078_v54 = vadd.f32 %v4017_v51, %v2077_v53  ;;  %v4305_v55 = vpop.f32.mrb[21].mxu0 }
 0x968   : > { %v2080_v56 = vpop.f32.mrb[22].mxu0 }
 0x969   : > { %v4021_v57 = vmul.f32 -1.702, %v2078_v54  ;;  %v4306_v59 = vpop.f32.mrb[23].mxu0 }
 0x96b   : > { %v2085_v62 = vmul.f32 1.442695, %v4021_v57 }
 0x96d   : > { %4556 = vpow2.f32 %v2085_v62 }
 0x977   : > { %v4557_v25 = vpop.eup %4556 }
 0x978   : > { %v2087_v63 = vadd.f32 1.0, %v4557_v25 }
 0x97a   : > { %4558 = vrcp.f32 %v2087_v63 }
 0x984   : > { %v4559_v1 = vpop.eup %4558 }
 0x985   : > { %v2090_v2 = vmul.f32 %v4559_v1, %v2078_v54 }
 0x987   : > { %v2091_v3 = vpack.c.bf16 %v2090_v2, %v2090_v2 }
 0x989   : > { %4324 = vmatmul.mubr.bf16.vlgmr.msra.gmra.mrb[28].mxu1 %v2091_v3 }
 0x98a   : > { %4359 = vmatprep.mubr.msk.bf16.mxu1 %vm4651_vm1, %v4650_v9 }
 0xa5c   : > { %v2197_v5 = vpop.f32.mrb[28].mxu1 }
 0xa5d   : > { %v2198_v60 = vadd.f32 %v4022_v4, %v2197_v5  ;;  %v4325_v61 = vpop.f32.mrb[29].mxu1 }
 0xa5e   : > { %v2200_v8 = vpop.f32.mrb[30].mxu1 }
 0xa5f   : > { %v5134_v10 = vadd.f32 %v2198_v60, %v5070_v7  ;;  %v4326_v11 = vpop.f32.mrb[31].mxu1  ;;  %v4033_v7 = vld [vmem:[%s5545_s22 + $0x1] ss:$0 sm:$0xff] }
 0xa61   : > { %v2208_v12 = vsel %vm675_vm0, %v5134_v10, 0.0 }
 0xa62   : > { %2209 = vadd.xlane.f32.xlu0 %v2208_v12 }
 0xaef   : > { %v2210_v13 = vpop.xlane.xlu0 %2209 }
 0xaf0   : > { %v2211_v14 = vmul.f32 0.03125, %v2210_v13 }
 0xaf2   : > { %v2212_v15 = vsub.f32 %v5134_v10, %v2211_v14 }
 0xaf4   : > { %v2213_v16 = vmul.f32 %v2212_v15, %v2212_v15 }
 0xaf6   : > { %v2214_v17 = vsel %vm675_vm0, %v2213_v16, 0.0 }
 0xaf7   : > { %2215 = vadd.xlane.f32.xlu1 %v2214_v17 }
 0xb84   : > { %v2216_v20 = vpop.xlane.xlu1 %2215 }
 0xb85   : > { %v2217_v21 = vmul.f32 0.03125, %v2216_v20 }
 0xb87   : > { %v2218_v6 = vadd.f32 1e-05, %v2217_v21 }
 0xb89   : > { %4560 = vrsqrt.f32 %v2218_v6 }
 0xb93   : > { %v4561_v22 = vpop.eup %4560 }
 0xb94   : > { %v2220_v23 = vmul.f32 %v4561_v22, %v2212_v15 }
 0xb96   : > { %v2227_v27 = vmul.f32 %v4033_v7, %v2220_v23 }
 0xb98   : > { %v2234_v28 = vadd.f32 %v4034_v26, %v2227_v27 }
 0xb9a   : > { %v2235_v30 = vpack.c.bf16 %v2234_v28, %v2234_v28 }
 0xb9c   : > { %4332 = vmatmul.mubr.msk.bf16.vlgmr.msra.gmra.mrb[24].mxu0 %vm675_vm0, %v2235_v30 }
 0xb9d   : > { %4336 = vmatpush3.bf16.msra.mxu0 %v4518_v29  ;;  %4339 = vmatprep.mubr.msk.bf16.mxu0 %vm4651_vm1, %v4650_v9 }
 0xb9e   : > { %4337 = vmatprep.subr.bf16.mxu0 %v4650_v9 }
 0xba1   : > { %4338 = vmatpush3.bf16.msra.mxu0 %v4519_v31 }
 0xba2   : > { %4343 = vmatprep.subr.bf16.mxu0 %v4650_v9 }
 0xba4   : > { %4340 = vmatmul.mubr.msk.bf16.vlgmr.msra.gmra.mrb[28].mxu0 %vm675_vm0, %v2235_v30 }
 0xba5   : > { %4344 = vmatpush3.bf16.msra.mxu0 %v4520_v32  ;;  %4347 = vmatprep.mubr.msk.bf16.mxu0 %vm4651_vm1, %v4650_v9 }
 0xba6   : > { %4345 = vmatprep.subr.bf16.mxu0 %v4650_v9 }
 0xba9   : > { %4346 = vmatpush3.bf16.msra.mxu0 %v4521_v0 }
 0xbaa   : > { %4351 = vmatprep.subr.bf16.mxu0 %v4650_v9 }
 0xbac   : > { %4348 = vmatmul.mubr.msk.bf16.vlgmr.msra.gmra.mrb[32].mxu0 %vm675_vm0, %v2235_v30 }
 0xbad   : > { %4353 = vmatprep.mubr.msk.bf16.mxu0 %vm4651_vm1, %v4650_v9 }
 0xc6f   : > { %v2298_v33 = vpop.f32.mrb[24].mxu0 }
 0xc70   : > { %v4333_v34 = vpop.f32.mrb[25].mxu0  ;;  %v2299_v38 = vadd.f32 %v4040_v37, %v2298_v33 }
 0xc71   : > { %v2301_v35 = vpop.f32.mrb[26].mxu0 }
 0xc72   : > { %v4334_v36 = vpop.f32.mrb[27].mxu0  ;;  %v2434_v45 = vmul.f32 0.35355338, %v2299_v38 }
 0xc77   : > { %v2363_v43 = vpop.f32.mrb[28].mxu0 }
 0xc78   : > { %v2364_v39 = vadd.f32 %v4049_v42, %v2363_v43  ;;  %v4341_v40 = vpop.f32.mrb[29].mxu0 }
 0xc79   : > { %v2366_v41 = vpop.f32.mrb[30].mxu0 }
 0xc7a   : > { %2585 = vrot.lane.b32.xlu1 %v2364_v39, %s5550_s2  ;;  %2582 = vrot.lane.b32.xlu0 %v2364_v39, %s5551_s24  ;;  %v4342_v44 = vpop.f32.mrb[31].mxu0 }
 0xc7e   : > { %2588 = vrot.lane.b32.xlu1 %v2364_v39, %s5552_s26  ;;  %2436 = vrot.lane.b32.xlu0 %v2434_v45, %s5551_s24 }
 0xc7f   : > { %v5189_v46 = vpop.f32.mrb[32].mxu0 }
 0xc80   : > { %v4349_v47 = vpop.f32.mrb[33].mxu0 }
 0xc81   : > { %v2431_v48 = vpop.f32.mrb[34].mxu0 }
 0xc82   : > { %2439 = vrot.lane.b32.xlu1 %v2434_v45, %s5550_s2  ;;  %2442 = vrot.lane.b32.xlu0 %v2434_v45, %s5552_s26  ;;  %v4350_v49 = vpop.f32.mrb[35].mxu0 }
 0xcec   : > { %v2586_v50 = vpop.permute.xlu1 %2585  ;;  %v2583_v51 = vpop.permute.xlu0 %2582 }
 0xced   : > { %v2591_v53 = vcombine.low %v2364_v39, %v2586_v50  ;;  %v2592_v54 = vcombine.high %v2364_v39, %v2586_v50 }
 0xcef   : > { %v2599_v62 = vrot.slane %v2591_v53, %v4900_v52  ;;  %v2606_v25 = vrot.slane %v2592_v54, %v4900_v52 }
 0xcf0   : > { %v2589_v55 = vpop.permute.xlu1 %2588  ;;  %v2437_v56 = vpop.permute.xlu0 %2436 }
 0xcf1   : > { %v2607_v57 = vcombine.low %v2583_v51, %v2589_v55  ;;  %v2608_v59 = vcombine.high %v2583_v51, %v2589_v55 }
 0xcf3   : > { %v2615_v63 = vrot.slane %v2607_v57, %v4900_v52  ;;  %v2622_v1 = vrot.slane %v2608_v59, %v4900_v52 }
 0xcf4   : > { %v2440_v2 = vpop.permute.xlu1 %2439  ;;  %v2443_v3 = vpop.permute.xlu0 %2442 }
 0xcf5   : > { %v2623_v4 = vcombine.low %v2599_v62, %v2615_v63  ;;  %v2624_v5 = vcombine.high %v2599_v62, %v2615_v63  ;;  %v2639_v60 = vcombine.low %v2606_v25, %v2622_v1  ;;  %v2640_v61 = vcombine.high %v2606_v25, %v2622_v1 }
 0xcf6   : > { %v2445_v8 = vcombine.low %v2434_v45, %v2440_v2  ;;  %v2446_v11 = vcombine.high %v2434_v45, %v2440_v2  ;;  %v2461_v12 = vcombine.low %v2437_v56, %v2443_v3  ;;  %v2462_v13 = vcombine.high %v2437_v56, %v2443_v3 }
 0xcf7   : > { %v2631_v14 = vrot.slane %v2623_v4, %v4903_v58  ;;  %v2638_v15 = vrot.slane %v2624_v5, %v4903_v58  ;;  %v2647_v16 = vrot.slane %v2639_v60, %v4903_v58  ;;  %v2654_v17 = vrot.slane %v2640_v61, %v4903_v58 }
 0xcf8   : > { %v2453_v18 = vrot.slane %v2445_v8, %v4900_v52  ;;  %v2460_v19 = vrot.slane %v2446_v11, %v4900_v52  ;;  %v2469_v20 = vrot.slane %v2461_v12, %v4900_v52  ;;  %v2476_v21 = vrot.slane %v2462_v13, %v4900_v52 }
 0xcf9   : > { %v2659_v6 = vcombine.low %v2631_v14, %v2638_v15  ;;  %v4064_v22 = vcombine.high %v2631_v14, %v2638_v15  ;;  %v2675_v7 = vcombine.low %v2647_v16, %v2654_v17  ;;  %v4065_v23 = vcombine.high %v2647_v16, %v2654_v17 }
 0xcfa   : > { %v2477_v26 = vcombine.low %v2453_v18, %v2469_v20  ;;  %v2478_v27 = vcombine.high %v2453_v18, %v2469_v20  ;;  %v2493_v28 = vcombine.low %v2460_v19, %v2476_v21  ;;  %v2494_v29 = vcombine.high %v2460_v19, %v2476_v21 }
 0xcfb   : > { %v2666_v30 = vrot.slane %v2659_v6, %v4900_v52  ;;  %v2674_v31 = vrot.slane %v4064_v22, %v4900_v52  ;;  %v2682_v32 = vrot.slane %v2675_v7, %v4900_v52  ;;  %v2690_v0 = vrot.slane %v4065_v23, %v4900_v52 }
 0xcfc   : > { %v2485_v33 = vrot.slane %v2477_v26, %v4903_v58  ;;  %v2492_v34 = vrot.slane %v2478_v27, %v4903_v58  ;;  %v2501_v35 = vrot.slane %v2493_v28, %v4903_v58  ;;  %v2508_v36 = vrot.slane %v2494_v29, %v4903_v58 }
 0xcfd   : > { %v2691_v37 = vcombine.low %v2666_v30, %v2674_v31  ;;  %v2707_v42 = vcombine.low %v2682_v32, %v2690_v0  ;;  %v2692_v43 = vcombine.high %v2666_v30, %v2674_v31  ;;  %v2708_v38 = vcombine.high %v2682_v32, %v2690_v0 }
 0xcfe   : > { %v2513_v39 = vcombine.low %v2485_v33, %v2492_v34  ;;  %v4062_v40 = vcombine.high %v2485_v33, %v2492_v34  ;;  %v2529_v41 = vcombine.low %v2501_v35, %v2508_v36  ;;  %v4063_v44 = vcombine.high %v2501_v35, %v2508_v36 }
 0xcff   : > { %v2699_v45 = vrot.slane %v2691_v37, %v4903_v58  ;;  %v2715_v47 = vrot.slane %v2707_v42, %v4903_v58  ;;  %v2706_v55 = vrot.slane %v2692_v43, %v4903_v58  ;;  %v2722_v56 = vrot.slane %v2708_v38, %v4903_v58 }
 0xd00   : > { %v2520_v48 = vrot.slane %v2513_v39, %v4900_v52  ;;  %v2528_v49 = vrot.slane %v4062_v40, %v4900_v52  ;;  %v2536_v50 = vrot.slane %v2529_v41, %v4900_v52  ;;  %v2544_v51 = vrot.slane %v4063_v44, %v4900_v52 }
 0xd01   : > { %v2723_v53 = vcombine.low %v2699_v45, %v2715_v47  ;;  %v2724_v54 = vcombine.high %v2699_v45, %v2715_v47  ;;  %v2725_v4 = vcombine.low %v2706_v55, %v2722_v56  ;;  %v2726_v5 = vcombine.high %v2706_v55, %v2722_v56 }
 0xd02   : > { %v2545_v57 = vcombine.low %v2520_v48, %v2528_v49  ;;  %v2561_v59 = vcombine.low %v2536_v50, %v2544_v51  ;;  %v2546_v60 = vcombine.high %v2520_v48, %v2528_v49  ;;  %v2562_v61 = vcombine.high %v2536_v50, %v2544_v51  ;;  %v4058_v48 = vld [vmem:[%s5492_s9 + $0x1] ss:$0 sm:$0xff] }
 0xd03   : > { %v2877_v62 = vpack.c.bf16 %v2723_v53, %v2723_v53  ;;  %v2878_v25 = vpack.c.bf16 %v2724_v54, %v2724_v54  ;;  %v2879_v12 = vpack.c.bf16 %v2725_v4, %v2725_v4  ;;  %v2880_v13 = vpack.c.bf16 %v2726_v5, %v2726_v5 }
 0xd04   : > { %v2553_v63 = vrot.slane %v2545_v57, %v4903_v58  ;;  %v2569_v1 = vrot.slane %v2561_v59, %v4903_v58  ;;  %v2560_v16 = vrot.slane %v2546_v60, %v4903_v58  ;;  %v2576_v17 = vrot.slane %v2562_v61, %v4903_v58 }
 0xd05   : > { %v2885_v2 = vsel %vm1344_vm3, %v2877_v62, 0  ;;  %v2931_v3 = vsel %vm1344_vm3, %v2878_v25, 0  ;;  %v2977_v18 = vsel %vm1344_vm3, %v2879_v12, 0  ;;  %v3023_v19 = vsel %vm1344_vm3, %v2880_v13, 0 }
 0xd06   : > { %4352 = vmatpush3.bf16.xpose.msra.mxu0 %v2885_v2  ;;  %4358 = vmatpush3.bf16.xpose.msra.mxu1 %v2931_v3  ;;  %v2577_v8 = vcombine.low %v2553_v63, %v2569_v1  ;;  %v2578_v11 = vcombine.high %v2553_v63, %v2569_v1  ;;  %v2579_v20 = vcombine.low %v2560_v16, %v2576_v17 }
 0xd07   : > { %4363 = vmatprep.subr.bf16.mxu0 %v4650_v9  ;;  %4369 = vmatprep.subr.bf16.mxu1 %v4650_v9  ;;  %v2580_v21 = vcombine.high %v2560_v16, %v2576_v17  ;;  %v2429_v49 = vadd.f32 %v4058_v48, %v5189_v46 }
 0xd08   : > { %v2873_v14 = vpack.c.bf16 %v2577_v8, %v2577_v8  ;;  %v2874_v15 = vpack.c.bf16 %v2578_v11, %v2578_v11  ;;  %v2875_v6 = vpack.c.bf16 %v2579_v20, %v2579_v20 }
 0xd09   : > { %v2876_v22 = vpack.c.bf16 %v2580_v21, %v2580_v21 }
 0xd0d   : > { %4354 = vmatmul.mubr.msk.bf16.vlgmr.msra.gmra.mrb[36].mxu0 %vm1344_vm3, %v2873_v14  ;;  %4360 = vmatmul.mubr.msk.bf16.vlgmr.msra.gmra.mrb[32].mxu1 %vm1344_vm3, %v2874_v15 }
 0xd0e   : > { %4364 = vmatpush3.bf16.xpose.msra.mxu0 %v2977_v18  ;;  %4370 = vmatpush3.bf16.xpose.msra.mxu1 %v3023_v19 }
 0xd0f   : > { %4365 = vmatprep.mubr.msk.bf16.mxu0 %vm4651_vm1, %v4650_v9  ;;  %4371 = vmatprep.mubr.msk.bf16.mxu1 %vm4651_vm1, %v4650_v9 }
 0xd10   : > { %4375 = vmatprep.subr.bf16.mxu0 %v4650_v9  ;;  %4381 = vmatprep.subr.bf16.mxu1 %v4650_v9 }
 0xd15   : > { %4366 = vmatmul.mubr.msk.bf16.vlgmr.msra.gmra.mrb[40].mxu0 %vm1344_vm3, %v2875_v6  ;;  %4372 = vmatmul.mubr.msk.bf16.vlgmr.msra.gmra.mrb[36].mxu1 %vm1344_vm3, %v2876_v22 }
 0xd16   : > { %4377 = vmatprep.mubr.msk.bf16.mxu0 %vm4651_vm1, %v4650_v9  ;;  %4383 = vmatprep.mubr.msk.bf16.mxu1 %vm4651_vm1, %v4650_v9 }
 0xde0   : > { %v2921_v7 = vpop.f32.mrb[36].mxu0  ;;  %v2967_v23 = vpop.f32.mrb[32].mxu1 }
 0xde1   : > { %v2922_v26 = vadd.f32 %v2921_v7, %v4960_v24  ;;  %v2968_v27 = vadd.f32 %v2967_v23, %v4960_v24  ;;  %v4355_v28 = vpop.f32.mrb[37].mxu0  ;;  %v4361_v29 = vpop.f32.mrb[33].mxu1 }
 0xde2   : > { %v2924_v30 = vpop.f32.mrb[38].mxu0  ;;  %v2970_v31 = vpop.f32.mrb[34].mxu1 }
 0xde3   : > { %v4356_v32 = vpop.f32.mrb[39].mxu0  ;;  %v4362_v0 = vpop.f32.mrb[35].mxu1  ;;  %v3065_v33 = vsel %vm1344_vm3, %v2922_v26, -inf  ;;  %v3068_v34 = vsel %vm1344_vm3, %v2968_v27, -inf }
 0xde4   : > { %3066 = vmax.xlane.f32.xlu1 %v3065_v33  ;;  %3069 = vmax.xlane.f32.xlu0 %v3068_v34 }
 0xde8   : > { %v3013_v35 = vpop.f32.mrb[40].mxu0  ;;  %v3059_v36 = vpop.f32.mrb[36].mxu1 }
 0xde9   : > { %v3014_v37 = vadd.f32 %v3013_v35, %v4960_v24  ;;  %v3060_v42 = vadd.f32 %v3059_v36, %v4960_v24  ;;  %v4367_v43 = vpop.f32.mrb[41].mxu0  ;;  %v4373_v38 = vpop.f32.mrb[37].mxu1 }
 0xdea   : > { %v3016_v39 = vpop.f32.mrb[42].mxu0  ;;  %v3062_v40 = vpop.f32.mrb[38].mxu1 }
 0xdeb   : > { %v4368_v41 = vpop.f32.mrb[43].mxu0  ;;  %v4374_v44 = vpop.f32.mrb[39].mxu1  ;;  %v3071_v45 = vsel %vm1344_vm3, %v3014_v37, -inf  ;;  %v3074_v47 = vsel %vm1344_vm3, %v3060_v42, -inf }
 0xdec   : > { %3072 = vmax.xlane.f32.xlu0 %v3071_v45  ;;  %3075 = vmax.xlane.f32.xlu1 %v3074_v47 }
 0xdfd   : > { %2731 = vrot.lane.b32.xlu1 %v2429_v49, %s5550_s2 }
 0xe71   : > { %v3067_v24 = vpop.xlane.xlu1 %3066  ;;  %v3070_v50 = vpop.xlane.xlu0 %3069 }
 0xe72   : > { %v3077_v51 = vsub.f32 %v2922_v26, %v3067_v24  ;;  %v3078_v53 = vsub.f32 %v2968_v27, %v3070_v50 }
 0xe74   : > { %v3081_v54 = vmul.f32 1.442695, %v3077_v51  ;;  %v3083_v55 = vmul.f32 1.442695, %v3078_v53 }
 0xe76   : > { %4562 = vpow2.f32 %v3081_v54 }
 0xe77   : > { %4564 = vpow2.f32 %v3083_v55 }
 0xe79   : > { %v3073_v62 = vpop.xlane.xlu0 %3072  ;;  %v3076_v25 = vpop.xlane.xlu1 %3075 }
 0xe7a   : > { %v3079_v63 = vsub.f32 %v3014_v37, %v3073_v62  ;;  %v3080_v1 = vsub.f32 %v3060_v42, %v3076_v25 }
 0xe7c   : > { %v3085_v2 = vmul.f32 1.442695, %v3079_v63  ;;  %v3087_v3 = vmul.f32 1.442695, %v3080_v1 }
 0xe7d   : > { %v2732_v8 = vpop.permute.xlu1 %2731 }
 0xe7e   : > { %4566 = vpow2.f32 %v3085_v2  ;;  %v2737_v13 = vcombine.low %v2429_v49, %v2732_v8  ;;  %v2738_v14 = vcombine.high %v2429_v49, %v2732_v8 }
 0xe7f   : > { %4568 = vpow2.f32 %v3087_v3 }
 0xe80   : > { %v5258_v56 = vpop.eup %4562  ;;  %v2745_v19 = vrot.slane %v2737_v13, %v4900_v52  ;;  %v2752_v20 = vrot.slane %v2738_v14, %v4900_v52 }
 0xe81   : > { %v5260_v57 = vpop.eup %4564  ;;  %v3089_v59 = vsel %vm1344_vm3, %v5258_v56, 0.0 }
 0xe82   : > { %3090 = vadd.xlane.f32.xlu0 %v3089_v59  ;;  %v3092_v46 = vsel %vm1344_vm3, %v5260_v57, 0.0 }
 0xe83   : > { %3093 = vadd.xlane.f32.xlu1 %v3092_v46 }
 0xe88   : > { %v5268_v4 = vpop.eup %4566 }
 0xe89   : > { %v5270_v5 = vpop.eup %4568  ;;  %v3095_v60 = vsel %vm1344_vm3, %v5268_v4, 0.0 }
 0xe8a   : > { %v3098_v61 = vsel %vm1344_vm3, %v5270_v5, 0.0 }
 0xe94   : > { %2734 = vrot.lane.b32.xlu1 %v2429_v49, %s5552_s26  ;;  %s5554_s26 = smov 8  }
 0xe98   : > { %2728 = vrot.lane.b32.xlu0 %v2429_v49, %s5551_s24  ;;  %s5553_s24 = smov 16  }
 0xeb7   : > { %3096 = vadd.xlane.f32.xlu0 %v3095_v60 }
 0xeb8   : > { %3099 = vadd.xlane.f32.xlu1 %v3098_v61 }
 0xf0f   : > { %v3091_v11 = vpop.xlane.xlu0 %3090 }
 0xf10   : > { %v3094_v12 = vpop.xlane.xlu1 %3093  ;;  %4570 = vrcp.f32 %v3091_v11 }
 0xf11   : > { %4572 = vrcp.f32 %v3094_v12 }
 0xf13   : > { %v2729_v15 = vpop.permute.xlu0 %2728 }
 0xf14   : > { %v2735_v16 = vpop.permute.xlu1 %2734 }
 0xf15   : > { %v2753_v17 = vcombine.low %v2729_v15, %v2735_v16  ;;  %v2754_v18 = vcombine.high %v2729_v15, %v2735_v16 }
 0xf17   : > { %v2761_v21 = vrot.slane %v2753_v17, %v4900_v52  ;;  %v2768_v6 = vrot.slane %v2754_v18, %v4900_v52 }
 0xf19   : > { %v2769_v22 = vcombine.low %v2745_v19, %v2761_v21  ;;  %v2770_v7 = vcombine.high %v2745_v19, %v2761_v21  ;;  %v2785_v23 = vcombine.low %v2752_v20, %v2768_v6  ;;  %v2786_v26 = vcombine.high %v2752_v20, %v2768_v6 }
 0xf1a   : > { %v4571_v44 = vpop.eup %4570 }
 0xf1b   : > { %v2777_v27 = vrot.slane %v2769_v22, %v4903_v58  ;;  %v2784_v28 = vrot.slane %v2770_v7, %v4903_v58  ;;  %v2793_v29 = vrot.slane %v2785_v23, %v4903_v58  ;;  %v2800_v30 = vrot.slane %v2786_v26, %v4903_v58  ;;  %v4573_v48 = vpop.eup %4572 }
 0xf1c   : > { %v3105_v53 = vmul.f32 %v4571_v44, %v5258_v56  ;;  %v3106_v54 = vmul.f32 %v4573_v48, %v5260_v57 }
 0xf1d   : > { %v2805_v31 = vcombine.low %v2777_v27, %v2784_v28  ;;  %v4066_v32 = vcombine.high %v2777_v27, %v2784_v28  ;;  %v2821_v0 = vcombine.low %v2793_v29, %v2800_v30  ;;  %v4067_v33 = vcombine.high %v2793_v29, %v2800_v30 }
 0xf1e   : > { %v3109_v1 = vpack.c.bf16 %v3105_v53, %v3105_v53  ;;  %v3110_v2 = vpack.c.bf16 %v3106_v54, %v3106_v54 }
 0xf1f   : > { %v2812_v34 = vrot.slane %v2805_v31, %v4900_v52  ;;  %v2820_v35 = vrot.slane %v4066_v32, %v4900_v52  ;;  %v2828_v36 = vrot.slane %v2821_v0, %v4900_v52  ;;  %v2836_v37 = vrot.slane %v4067_v33, %v4900_v52 }
 0xf21   : > { %v2837_v42 = vcombine.low %v2812_v34, %v2820_v35  ;;  %v2838_v43 = vcombine.high %v2812_v34, %v2820_v35  ;;  %v2853_v38 = vcombine.low %v2828_v36, %v2836_v37  ;;  %v2854_v39 = vcombine.high %v2828_v36, %v2836_v37 }
 0xf23   : > { %v2845_v40 = vrot.slane %v2837_v42, %v4903_v58  ;;  %v2852_v41 = vrot.slane %v2838_v43, %v4903_v58  ;;  %v2861_v45 = vrot.slane %v2853_v38, %v4903_v58  ;;  %v2868_v47 = vrot.slane %v2854_v39, %v4903_v58  ;;  %v4522_v38 = vld [vmem:[%s5493_s10 + $0x10] sm:$0xff]  }
 0xf25   : > { %v2869_v49 = vcombine.low %v2845_v40, %v2861_v45  ;;  %v2870_v24 = vcombine.high %v2845_v40, %v2861_v45  ;;  %v2871_v50 = vcombine.low %v2852_v41, %v2868_v47  ;;  %v2872_v51 = vcombine.high %v2852_v41, %v2868_v47 }
 0xf27   : > { %v3113_v55 = vpack.c.bf16 %v2869_v49, %v2869_v49  ;;  %v3114_v59 = vpack.c.bf16 %v2870_v24, %v2870_v24  ;;  %v3115_v25 = vpack.c.bf16 %v2871_v50, %v2871_v50  ;;  %v3116_v63 = vpack.c.bf16 %v2872_v51, %v2872_v51  ;;  %v4523_v24 = vld [vmem:[%s5493_s10 + $0x18] sm:$0xff]  }
 0xf29   : > { %v3121_v46 = vsel %vm1584_vm4, %v3113_v55, 0  ;;  %v3167_v62 = vsel %vm1584_vm4, %v3114_v59, 0  ;;  %v3213_v56 = vsel %vm1584_vm4, %v3115_v25, 0  ;;  %v3259_v57 = vsel %vm1584_vm4, %v3116_v63, 0 }
 0xf2a   : > { %4376 = vmatpush3.bf16.msra.mxu0 %v3121_v46  ;;  %4382 = vmatpush3.bf16.msra.mxu1 %v3167_v62 }
 0xf2b   : > { %4387 = vmatprep.subr.bf16.mxu0 %v4650_v9  ;;  %4393 = vmatprep.subr.bf16.mxu1 %v4650_v9 }
 0xf2d   : > { %4378 = vmatmul.mubr.msk.bf16.vlgmr.msra.gmra.mrb[44].mxu0 %vm1344_vm3, %v3109_v1  ;;  %4384 = vmatmul.mubr.msk.bf16.vlgmr.msra.gmra.mrb[40].mxu1 %vm1344_vm3, %v3110_v2 }
 0xf2e   : > { %4388 = vmatpush3.bf16.msra.mxu0 %v3213_v56  ;;  %4394 = vmatpush3.bf16.msra.mxu1 %v3259_v57 }
 0xf2f   : > { %4389 = vmatprep.mubr.msk.bf16.mxu0 %vm4651_vm1, %v4650_v9  ;;  %4395 = vmatprep.mubr.msk.bf16.mxu1 %vm4651_vm1, %v4650_v9 }
 0xf30   : > { %4399 = vmatprep.subr.bf16.mxu0 %v4650_v9  ;;  %4407 = vmatprep.subr.bf16.mxu1 %v4650_v9 }
 0xf44   : > { %v3097_v3 = vpop.xlane.xlu0 %3096 }
 0xf45   : > { %4574 = vrcp.f32 %v3097_v3  ;;  %v3100_v60 = vpop.xlane.xlu1 %3099 }
 0xf46   : > { %4576 = vrcp.f32 %v3100_v60 }
 0xf4f   : > { %v4575_v61 = vpop.eup %4574 }
 0xf50   : > { %v4577_v8 = vpop.eup %4576  ;;  %v3107_v11 = vmul.f32 %v4575_v61, %v5268_v4 }
 0xf51   : > { %v3108_v12 = vmul.f32 %v4577_v8, %v5270_v5 }
 0xf52   : > { %v3111_v13 = vpack.c.bf16 %v3107_v11, %v3107_v11 }
 0xf53   : > { %v3112_v14 = vpack.c.bf16 %v3108_v12, %v3108_v12 }
 0xf54   : > { %4390 = vmatmul.mubr.msk.bf16.vlgmr.msra.gmra.mrb[48].mxu0 %vm1344_vm3, %v3111_v13 }
 0xf55   : > { %4396 = vmatmul.mubr.msk.bf16.vlgmr.msra.gmra.mrb[44].mxu1 %vm1344_vm3, %v3112_v14  ;;  %4403 = vmatprep.mubr.msk.bf16.mxu0 %vm4651_vm1, %v4650_v9  ;;  %v4083_v14 = vld [vmem:[%s5494_s11 + $0x1] ss:$0 sm:$0xff] }
 0xf56   : > { %4411 = vmatprep.mubr.msk.bf16.mxu1 %vm4651_vm1, %v4650_v9  ;;  %4400 = vmatpush3.bf16.msra.mxu0 %v4522_v38  ;;  %v4531_v38 = vld [vmem:[%s5499_s16 + $0x68] sm:$0xff]  }
 0xf57   : > { %4401 = vmatprep.subr.bf16.mxu0 %v4650_v9 }
 0xf5a   : > { %4402 = vmatpush3.bf16.msra.mxu0 %v4523_v24 }
 0xf5b   : > { %4415 = vmatprep.subr.bf16.mxu0 %v4650_v9 }
0x1000   : > { %v3157_v15 = vpop.f32.mrb[44].mxu0  ;;  %v3203_v16 = vpop.f32.mrb[40].mxu1 }
0x1001   : > { %v4379_v17 = vpop.f32.mrb[45].mxu0  ;;  %v4385_v18 = vpop.f32.mrb[41].mxu1 }
0x1002   : > { %v3160_v19 = vpop.f32.mrb[46].mxu0  ;;  %v3206_v4 = vpop.f32.mrb[42].mxu1 }
0x1003   : > { %v4380_v20 = vpop.f32.mrb[47].mxu0  ;;  %v4386_v5 = vpop.f32.mrb[43].mxu1 }
0x1027   : > { %v3249_v21 = vpop.f32.mrb[48].mxu0 }
0x1028   : > { %v3301_v6 = vcombine.low %v3157_v15, %v3249_v21  ;;  %v3302_v22 = vcombine.high %v3157_v15, %v3249_v21  ;;  %v3295_v7 = vpop.f32.mrb[44].mxu1  ;;  %v4391_v23 = vpop.f32.mrb[49].mxu0 }
0x1029   : > { %v3317_v26 = vcombine.low %v3203_v16, %v3295_v7  ;;  %v3318_v27 = vcombine.high %v3203_v16, %v3295_v7  ;;  %v4397_v28 = vpop.f32.mrb[45].mxu1  ;;  %v3252_v29 = vpop.f32.mrb[50].mxu0  ;;  %v4524_v23 = vld [vmem:[%s5497_s14 + $0x10] sm:$0xff]  }
0x102a   : > { %v3309_v30 = vrot.slane %v3301_v6, %v4900_v52  ;;  %v3316_v31 = vrot.slane %v3302_v22, %v4900_v52  ;;  %v3298_v32 = vpop.f32.mrb[46].mxu1  ;;  %v4392_v0 = vpop.f32.mrb[51].mxu0  ;;  %4408 = vmatpush3.bf16.msra.mxu1 %v4524_v23 }
0x102b   : > { %v3325_v33 = vrot.slane %v3317_v26, %v4900_v52  ;;  %v3332_v34 = vrot.slane %v3318_v27, %v4900_v52  ;;  %v4398_v35 = vpop.f32.mrb[47].mxu1  ;;  %4409 = vmatprep.subr.bf16.mxu1 %v4650_v9  ;;  %v4090_v32 = vld [vmem:[%s5496_s13 + $0x1] ss:$0 sm:$0xff] }
0x102c   : > { %v4526_v35 = vld [vmem:[%s5499_s16 + $0x40] sm:$0xff]  }
0x102d   : > { %v3333_v36 = vcombine.low %v3309_v30, %v3325_v33  ;;  %v3334_v37 = vcombine.high %v3309_v30, %v3325_v33  ;;  %v3349_v42 = vcombine.low %v3316_v31, %v3332_v34  ;;  %v3350_v43 = vcombine.high %v3316_v31, %v3332_v34  ;;  %v4089_v30 = vld [vmem:[%s5495_s12 + $0x1] ss:$0 sm:$0xff] }
0x102f   : > { %v3341_v39 = vrot.slane %v3333_v36, %v4903_v58  ;;  %v3348_v40 = vrot.slane %v3334_v37, %v4903_v58  ;;  %v3357_v41 = vrot.slane %v3349_v42, %v4903_v58  ;;  %v3364_v44 = vrot.slane %v3350_v43, %v4903_v58  ;;  %v4527_v36 = vld [vmem:[%s5499_s16 + $0x48] sm:$0xff]   ;;  %v4528_v37 = vld [vmem:[%s5499_s16 + $0x50] sm:$0xff]   ;;  %v4529_v42 = vld [vmem:[%s5499_s16 + $0x58] sm:$0xff]  }
0x1030   : > { %v4530_v43 = vld [vmem:[%s5499_s16 + $0x60] sm:$0xff]  }
0x1031   : > { %v3369_v45 = vcombine.low %v3341_v39, %v3348_v40  ;;  %v4076_v47 = vcombine.high %v3341_v39, %v3348_v40  ;;  %v3385_v48 = vcombine.low %v3357_v41, %v3364_v44  ;;  %v4077_v49 = vcombine.high %v3357_v41, %v3364_v44  ;;  %v4532_v39 = vld [vmem:[%s5499_s16 + $0x70] sm:$0xff]   ;;  %v4533_v40 = vld [vmem:[%s5499_s16 + $0x78] sm:$0xff]   ;;  %v4096_v41 = vld [vmem:[%s5498_s15 + $0x1] ss:$0 sm:$0xff] }
0x1033   : > { %v3376_v50 = vrot.slane %v3369_v45, %v4900_v52  ;;  %v3384_v51 = vrot.slane %v4076_v47, %v4900_v52  ;;  %v3392_v53 = vrot.slane %v3385_v48, %v4900_v52  ;;  %v3400_v54 = vrot.slane %v4077_v49, %v4900_v52 }
0x1035   : > { %v3402_v55 = vcombine.high %v3376_v50, %v3384_v51  ;;  %v3418_v59 = vcombine.high %v3392_v53, %v3400_v54  ;;  %v3401_v46 = vcombine.low %v3376_v50, %v3384_v51  ;;  %v3417_v62 = vcombine.low %v3392_v53, %v3400_v54 }
0x1037   : > { %v3416_v25 = vrot.slane %v3402_v55, %v4903_v58  ;;  %v3432_v63 = vrot.slane %v3418_v59, %v4903_v58  ;;  %v3409_v1 = vrot.slane %v3401_v46, %v4903_v58  ;;  %v3425_v2 = vrot.slane %v3417_v62, %v4903_v58  ;;  %v4118_v46 = vld [vmem:[%s5500_s17 + $0x1] ss:$0 sm:$0xff] }
0x1039   : > { %v3435_v56 = vcombine.low %v3416_v25, %v3432_v63  ;;  %v3434_v57 = vcombine.high %v3409_v1, %v3425_v2  ;;  %v3436_v3 = vcombine.high %v3416_v25, %v3432_v63  ;;  %v3433_v60 = vcombine.low %v3409_v1, %v3425_v2 }
0x103b   : > { %3442 = vrot.lane.b32.xlu1 %v3435_v56, %s5553_s24  ;;  %3438 = vrot.lane.b32.xlu0 %v3434_v57, %s5554_s26  ;;  %v3745_v57 = vld [vmem:[%s664_s27] sm:$0x1]  ;;  %s656_s27 = sand.u32 1, %s4640_s25   ;;  %s5557_s24 = sld [smem:[#allocation19_spill]] }
0x103c   : > { %s657_s30 = scalar_lea.vmem [#allocation2], %s656_s27 }
0x103d   : > { %s3912_s1 = sshll.u32 %s657_s30, 4  ;;  %s5443_s1 = int_to_ptr.vmem [resolvable:$true] %s3912_s1 }
0x103e   : > { %s4586_s4 = scalar_lea.vmem %s5443_s1, 16  ;;  %p4593_p0 = scmp.lt.s32.totalorder %s5443_s1, %s4591_s7 }
0x103f   : > { %3446 = vrot.lane.b32.xlu0 %v3436_v3, %s5555_s0  ;;  %s3900_s0 = scalar_lea.sflag [#allocation3], %s656_s27  ;;  %p4587_p11 = scmp.ne.s32.totalorder %s5443_s1, %s4586_s4 }
0x1040   : > { %p4594_p1 = scmp.lt.s32.totalorder %s4592_s6, %s4586_s4 }
0x1041   : > { %s5441_s26 = scalar_lea.hbm %s5557_s24, %s4131_s23  ;;  %p4588_p12 = pnand %p4587_p11, %p4810_p5 }
0x1042   : > { %p4595_p2 = por %p4594_p1, %p4593_p0 }
0x1043   : > { %p4589_p13 = pneg %p4588_p12 }
0x1045   : > { %p4596_p3 = pnand %p4595_p2, %p4589_p13 }
0x10ad   : > { %v3439_v52 = vpop.permute.xlu0 %3438  ;;  %v3443_v61 = vpop.permute.xlu1 %3442 }
0x10ae   : > { %v3449_v8 = vsel %vm1344_vm3, %v3433_v60, %v3439_v52 }
0x10af   : > { %v3450_v12 = vsel %vm1915_vm5, %v3449_v8, %v3443_v61 }
0x10b1   : > { %v3447_v11 = vpop.permute.xlu0 %3446 }
0x10b2   : > { %v3451_v13 = vsel %vm1917_vm6, %v3450_v12, %v3447_v11 }
0x10b3   : > { %v3452_v58 = vpack.c.bf16 %v3451_v13, %v3451_v13 }
0x10b5   : > { %4404 = vmatmul.mubr.msk.bf16.vlgmr.msra.gmra.mrb[52].mxu0 %vm675_vm0, %v3452_v58  ;;  %v4534_v58 = vld [vmem:[%s5503_s20] sm:$0xff]  }
0x10b6   : > { %4431 = vmatprep.mubr.msk.bf16.mxu0 %vm4651_vm1, %v4650_v9  ;;  %4416 = vmatpush3.bf16.msra.mxu0 %v4526_v35 }
0x10b7   : > { %4417 = vmatprep.subr.bf16.mxu0 %v4650_v9 }
0x10ba   : > { %4418 = vmatpush3.bf16.msra.mxu0 %v4527_v36 }
0x10bb   : > { %4419 = vmatprep.subr.bf16.mxu0 %v4650_v9 }
0x10be   : > { %4420 = vmatpush3.bf16.msra.mxu0 %v4528_v37 }
0x10bf   : > { %4421 = vmatprep.subr.bf16.mxu0 %v4650_v9 }
0x10c2   : > { %4422 = vmatpush3.bf16.msra.mxu0 %v4529_v42 }
0x10c3   : > { %4423 = vmatprep.subr.bf16.mxu0 %v4650_v9 }
0x10c6   : > { %4424 = vmatpush3.bf16.msra.mxu0 %v4530_v43 }
0x10c7   : > { %4425 = vmatprep.subr.bf16.mxu0 %v4650_v9 }
0x10ca   : > { %4426 = vmatpush3.bf16.msra.mxu0 %v4531_v38 }
0x10cb   : > { %4427 = vmatprep.subr.bf16.mxu0 %v4650_v9 }
0x10ce   : > { %4428 = vmatpush3.bf16.msra.mxu0 %v4532_v39 }
0x10cf   : > { %4429 = vmatprep.subr.bf16.mxu0 %v4650_v9 }
0x10d2   : > { %4430 = vmatpush3.bf16.msra.mxu0 %v4533_v40 }
0x1188   : > { %v3515_v15 = vpop.f32.mrb[52].mxu0 }
0x1189   : > { %v3516_v16 = vadd.f32 %v4083_v14, %v3515_v15  ;;  %v4405_v17 = vpop.f32.mrb[53].mxu0  ;;  %v4535_v14 = vld [vmem:[%s5503_s20 + $0x8] sm:$0xff]  }
0x118a   : > { %v3518_v18 = vpop.f32.mrb[54].mxu0 }
0x118b   : > { %v5353_v19 = vadd.f32 %v3516_v16, %v5134_v10  ;;  %v4406_v4 = vpop.f32.mrb[55].mxu0  ;;  %v4525_v10 = vld [vmem:[%s5497_s14 + $0x18] sm:$0xff]  }
0x118c   : > { %4410 = vmatpush3.bf16.msra.mxu1 %v4525_v10 }
0x118d   : > { %v3526_v20 = vsel %vm675_vm0, %v5353_v19, 0.0  ;;  %4435 = vmatprep.subr.mxu1 %v4650_v9 }
0x118e   : > { %3527 = vadd.xlane.f32.xlu1 %v3526_v20  ;;  %v3820_v20 = vld [vmem:[%s5502_s19] sm:$0x1] }
0x121b   : > { %v3528_v5 = vpop.xlane.xlu1 %3527 }
0x121c   : > { %v3529_v21 = vmul.f32 0.03125, %v3528_v5 }
0x121e   : > { %v3530_v6 = vsub.f32 %v5353_v19, %v3529_v21 }
0x1220   : > { %v3531_v22 = vmul.f32 %v3530_v6, %v3530_v6 }
0x1222   : > { %v3532_v7 = vsel %vm675_vm0, %v3531_v22, 0.0 }
0x1223   : > { %3533 = vadd.xlane.f32.xlu0 %v3532_v7 }
0x12b0   : > { %v3534_v26 = vpop.xlane.xlu0 %3533 }
0x12b1   : > { %v3535_v27 = vmul.f32 0.03125, %v3534_v26 }
0x12b3   : > { %v3536_v28 = vadd.f32 1e-05, %v3535_v27 }
0x12b5   : > { %4578 = vrsqrt.f32 %v3536_v28 }
0x12bf   : > { %v4579_v29 = vpop.eup %4578 }
0x12c0   : > { %v3538_v31 = vmul.f32 %v4579_v29, %v3530_v6 }
0x12c2   : > { %v3545_v0 = vmul.f32 %v4089_v30, %v3538_v31 }
0x12c4   : > { %v3552_v33 = vadd.f32 %v4090_v32, %v3545_v0 }
0x12c6   : > { %v3553_v34 = vpack.c.bf16 %v3552_v33, %v3552_v33 }
0x12c8   : > { %4412 = vmatmul.mubr.msk.bf16.vlgmr.msra.gmra.mrb[48].mxu1 %vm675_vm0, %v3553_v34 }
0x12c9   : > { %4437 = vmatprep.mubr.msk.f32.mxu1 %vm4651_vm1, %v4650_v9 }
0x139b   : > { %v3616_v44 = vpop.f32.mrb[48].mxu1 }
0x139c   : > { %v3617_v45 = vadd.f32 %v4096_v41, %v3616_v44  ;;  %v4413_v47 = vpop.f32.mrb[49].mxu1 }
0x139d   : > { %v3619_v48 = vpop.f32.mrb[50].mxu1 }
0x139e   : > { %v4100_v49 = vmul.f32 -1.702, %v3617_v45  ;;  %v4414_v24 = vpop.f32.mrb[51].mxu1 }
0x13a0   : > { %v3624_v50 = vmul.f32 1.442695, %v4100_v49 }
0x13a2   : > { %4580 = vpow2.f32 %v3624_v50 }
0x13ac   : > { %v4581_v51 = vpop.eup %4580 }
0x13ad   : > { %v3626_v53 = vadd.f32 1.0, %v4581_v51 }
0x13af   : > { %4582 = vrcp.f32 %v3626_v53 }
0x13b9   : > { %v4583_v54 = vpop.eup %4582 }
0x13ba   : > { %v3629_v55 = vmul.f32 %v4583_v54, %v3617_v45 }
0x13bc   : > { %v3630_v59 = vpack.c.bf16 %v3629_v55, %v3629_v55 }
0x13be   : > { %4432 = vmatmul.mubr.bf16.vlgmr.msra.gmra.mrb[56].mxu0 %v3630_v59 }
0x1491   : > { %v3738_v62 = vpop.f32.mrb[56].mxu0 }
0x1492   : > { %v3739_v25 = vadd.f32 %v4118_v46, %v3738_v62  ;;  %v4433_v63 = vpop.f32.mrb[57].mxu0 }
0x1493   : > { %v3741_v1 = vpop.f32.mrb[58].mxu0 }
0x1494   : > { %v3744_v2 = vadd.f32 %v3739_v25, %v5353_v19  ;;  %v4434_v56 = vpop.f32.mrb[59].mxu0  ;;  %v3819_v19 = vld [vmem:[%s5501_s18] sm:$0x1] }
0x1496   : > { %4436 = vmatpush3.msra.mxu1 %v3744_v2 }
0x1497   : > { %4438 = vmatmul.mubr.msk.f32.vlgmr.msra.gmra.mrb[52].mxu1 %vm1344_vm3, %v3745_v57  ;;  %4440 = vmatprep.subr.bf16.mxu1 %v4650_v9 }
0x1498   : > { %4444 = vmatprep.mubr.msk.bf16.mxu1 %vm4651_vm1, %v4650_v9  ;;  %4441 = vmatpush3.bf16.msra.mxu1 %v4534_v58 }
0x1499   : > { %4442 = vmatprep.subr.bf16.mxu1 %v4650_v9 }
0x149c   : > { %4443 = vmatpush3.bf16.msra.mxu1 %v4535_v14 }
0x156a   : > { %v3815_v3 = vpop.f32.mrb[52].mxu1 }
0x156b   : > { %v3822_v60 = vsel %vm3821_vm7, %v3815_v3, 0.0  ;;  %v4439_v52 = vpop.f32.mrb[53].mxu1 }
0x156c   : > { %3823 = vadd.xlane.f32.xlu0 %v3822_v60 }
0x15f9   : > { %v3824_v61 = vpop.xlane.xlu0 %3823 }
0x15fa   : > { %v3825_v8 = vmul.f32 0.03125, %v3824_v61 }
0x15fc   : > { %v3826_v11 = vsub.f32 %v3815_v3, %v3825_v8 }
0x15fe   : > { %v3827_v12 = vmul.f32 %v3826_v11, %v3826_v11 }
0x1600   : > { %v3828_v13 = vsel %vm3821_vm7, %v3827_v12, 0.0 }
0x1601   : > { %3829 = vadd.xlane.f32.xlu1 %v3828_v13 }
0x168e   : > { %v3830_v15 = vpop.xlane.xlu1 %3829 }
0x168f   : > { %v3831_v16 = vmul.f32 0.03125, %v3830_v15 }
0x1691   : > { %v3832_v17 = vadd.f32 1e-05, %v3831_v16 }
0x1693   : > { %4584 = vrsqrt.f32 %v3832_v17 }
0x169d   : > { %v4585_v18 = vpop.eup %4584 }
0x169e   : > { %v3834_v4 = vmul.f32 %v4585_v18, %v3826_v11 }
0x16a0   : > { %v3835_v5 = vmul.f32 %v3834_v4, %v3819_v19 }
0x16a2   : > { %v3836_v21 = vadd.f32 %v3835_v5, %v3820_v20 }
0x16a4   : > { %v3837_v6 = vpack.c.bf16 %v3836_v21, %v3836_v21 }
0x16a6   : > { %4445 = vmatmul.mubr.msk.bf16.vlgmr.msra.gmra.mrb[56].mxu1 %vm675_vm0, %v3837_v6 }
0x1779   : > { %v3891_v9 = vpop.f32.mrb[56].mxu1 }
0x177a   : > { %3898 = vst.msk [vmem:[%s657_s30] sm:$0x1] %vm3897_vm8, %v3891_v9  ;;  %v4446_v22 = vpop.f32.mrb[57].mxu1 }
0x177b   : > { %v3894_v7 = vpop.f32.mrb[58].mxu1 }
0x177c   : > { %4599 = shalt.err (!%p4596_p3)
}
0x177d   : > { %s4600_s27 = scalar_lea.hbm %s5441_s26, 16  ;;  %s4604_s2 = scalar_lea.hbm %s5557_s24, 32 }
0x177e   : > { %p4601_p4 = scmp.ne.s32.totalorder %s5441_s26, %s4600_s27  ;;  %p4605_p9 = scmp.lt.u32.totalorder %s5441_s26, %s5557_s24 }
0x177f   : > { %p4606_p10 = scmp.lt.u32.totalorder %s4604_s2, %s4600_s27  ;;  %p4608_p12 = scmp.lt.u32.totalorder %s4600_s27, %s5441_s26 }
0x1780   : > { %p4602_p7 = pnand %p4601_p4, %p4810_p5 }
0x1781   : > { %p4607_p11 = por %p4606_p10, %p4605_p9 }
0x1782   : > { %p4603_p8 = pneg %p4602_p7 }
0x1783   : > { %p4609_p13 = por %p4608_p12, %p4607_p11 }
0x1785   : > { %p4610_p0 = pnand %p4609_p13, %p4603_p8 }
0x1787   : > { %4613 = shalt.err (!%p4610_p0)
}
0x1788   : > { %4448 = dma.vmem_to_hbm [thread:$0]  (%p4810_p5), %s5443_s1, 16, %s5441_s26, %s3900_s0   ;;  %v4447_v23 = vpop.f32.mrb[59].mxu1 }
0x1789 PF: > { %s5558_s4 = sld [smem:[#allocation7_spill]]  ;;  %s5559_s6 = sld [smem:[#allocation5_spill]] }
0x178f   : > { %p4454_p1 = scmp.ge.s32.totalorder %s5558_s4, 2  ;;  %s3924_s30 = sand.u32 1, %s5559_s6  }
0x1790   : > { %s3925_s2 = scalar_lea.sflag [#allocation3], %s3924_s30 }
0x1791   : > { %p4451_p2 = pnand %p4454_p1, %p4814_p6 }
0x1793   : > { %4631 = dma.done.wait (!%p4451_p2), %s3925_s2, 16  }
0x1794   : > { %4633 = vsyncadd (!%p4451_p2), %s3925_s2, 4294967280  ;;  %s5561_s27 = sld [smem:[#allocation8_spill]]  ;;  %s5562_s3 = sld [smem:[#allocation6_spill]] }
0x1795   : > { %s5563_s26 = sld [smem:[#allocation9_spill]]  ;;  %s5564_s2 = smov %s4640_s25 }
0x179a   : > { %p31_p3 = scmp.ge.s32.totalorder %s5561_s27, 4   ;;  %s5565_s25 = smov %s5562_s3 }
0x179c   :  { %33 = sbr.rel (!%p31_p3) target bundleno = 13 (0xd), region = 158 }
0x17a3   :  { %3929 = vsyncpa [#allocation3], 1 }
0x17a4   :  { %3931 = vsyncpa [#allocation3 + $0x1], 1 }

</bundles_post_ra>
